<compile_context>
chip_gen: v7x
topology: tpu7x:2x2x1
jax: 0.10.0
libtpu: 0.0.40
codegen_flags: <defaults>
</compile_context>

<pallas_src>
import numpy as np
import jax
import jax.numpy as jnp
from jax.experimental import pallas as pl
from jax.experimental.pallas import tpu as pltpu

# ---------------------------------------------------------------------------
# Config (synthetic, small): flow_arch = 'realnvp_2l32', dim_z = 8, 1ch 16x16 x.
# ---------------------------------------------------------------------------
DIM_Z = 8
D_HALF = DIM_Z // 2
FLOW_LAYERS = 2            # 'realnvp_2l32'
FLOW_HIDDEN = 32
BN_EPS = 1e-3
# nflows ResidualNet uses BatchNorm1d(eps=1e-3); with fresh running stats
# (mean=0, var=1, gamma=1, beta=0) eval-BN is a pure scale 1/sqrt(1+eps).
BN_SCALE = float(1.0 / np.sqrt(1.0 + BN_EPS))

CONV_COUT = 8              # encoder conv out channels
H = W = 16                 # input spatial size (single channel)
HO = WO = 8                # after 3x3 / stride 2 / pad 1
DEC_HIDDEN = 64
DEC_OUT = 1 * H * W        # decoder output (flattened 1x16x16)

MAX_ROW_TILE = 256         # multiple of 256 (v6e/v7x MXU) and of 128 (v5e MXU)
SLAB_W = 384               # 3 * 128 lanes: lane-dense output slab width

# output slab layout: [x_out(256) | enc(16) | z_packed(8) | logdet(1) | pad]
OFF_XOUT = 0
OFF_ENC = DEC_OUT
OFF_ZPK = OFF_ENC + 2 * DIM_Z
OFF_LOGDET = OFF_ZPK + DIM_Z
OFF_PAD = OFF_LOGDET + 1

# latent packing: packed col j  <->  original latent dim Z_PACK_PERM[j]
Z_PACK_PERM = np.concatenate([np.arange(0, DIM_Z, 2), np.arange(1, DIM_Z, 2)])
INV_Z_PERM = np.argsort(Z_PACK_PERM)
# encoder fc output packing: [mu_even | mu_odd | logvar(unchanged)]
COL_PERM = np.concatenate([Z_PACK_PERM, DIM_Z + np.arange(DIM_Z)])
INV_COL_PERM = np.argsort(COL_PERM)

# packed flow-parameter slab: per-layer row offsets (lane width = FLOW_HIDDEN).
# Weight sub-blocks are 8-row aligned so in-kernel static slices stay tile-clean.
FR_W0 = 0                          # (D_HALF, 32)
FR_W1A = 8                         # (32, 32)
FR_W1B = FR_W1A + FLOW_HIDDEN      # (32, 32)
FR_W2A = FR_W1B + FLOW_HIDDEN      # (32, 32)
FR_W2B = FR_W2A + FLOW_HIDDEN      # (32, 32)
FR_WF = FR_W2B + FLOW_HIDDEN       # (32, 32) (only first 2*D_HALF cols used)
FR_B0 = FR_WF + FLOW_HIDDEN        # single bias rows
FR_B1A = FR_B0 + 1
FR_B1B = FR_B1A + 1
FR_B2A = FR_B1B + 1
FR_B2B = FR_B2A + 1
FR_BF = FR_B2B + 1
FLOW_ROWS = 176                    # rows padded to a multiple of 8


# ---------------------------------------------------------------------------
# Fused Pallas kernel: encoder -> flow (2 couplings) -> decoder, all in VMEM.
# ---------------------------------------------------------------------------
def fused_flowvae_kernel(x_ref, cw_ref, cb_ref, fcw_ref, fcb_ref, flow_ref,
                         dw1_ref, db1_ref, dw2_ref, db2_ref, out_ref):
    f32 = jnp.float32
    bf16 = jnp.bfloat16
    tb = x_ref.shape[0]

    # ---- Encoder: conv(3x3,s2,p1)+ReLU folded into one dense bf16 matmul whose
    # output columns are already in PyTorch NCHW-flatten order; then the f32 fc
    # whose mu columns were pre-permuted to packed [even | odd] order.
    x = x_ref[...].astype(bf16)                                        # (TB, 256)
    feat = jnp.dot(x, cw_ref[...], preferred_element_type=f32) + cb_ref[...]
    feat = jnp.maximum(feat, 0.0)                                      # (TB, 512)
    enc = jnp.dot(feat, fcw_ref[...], preferred_element_type=f32) + fcb_ref[...]

    z_e = enc[:, 0:D_HALF]             # latent dims [0,2,4,6]
    z_o = enc[:, D_HALF:DIM_Z]         # latent dims [1,3,5,7]

    # ---- RealNVP conditioner: nflows ResidualNet(num_blocks=2). Eval-BN scale
    # is already folded into the packed block linears at fold_params time.
    # TODO(synk): with a trained checkpoint, per-feature BN running stats /
    #             affine params must be folded there instead of a pure scale.
    def wmat(layer, r0, nrows):
        return flow_ref[layer, r0:r0 + nrows, :]

    def bvec(layer, r0):
        return flow_ref[layer, r0:r0 + 1, :]

    def conditioner(x_id, layer):
        h = (jnp.dot(x_id, wmat(layer, FR_W0, D_HALF),
                     preferred_element_type=f32) + bvec(layer, FR_B0))
        for wa, ba, wb, bb in ((FR_W1A, FR_B1A, FR_W1B, FR_B1B),
                               (FR_W2A, FR_B2A, FR_W2B, FR_B2B)):
            t = jnp.maximum(h, 0.0)
            t = (jnp.dot(t, wmat(layer, wa, FLOW_HIDDEN),
                         preferred_element_type=f32) + bvec(layer, ba))
            t = jnp.maximum(t, 0.0)
            t = (jnp.dot(t, wmat(layer, wb, FLOW_HIDDEN),
                         preferred_element_type=f32) + bvec(layer, bb))
            h = h + t
        return (jnp.dot(h, wmat(layer, FR_WF, FLOW_HIDDEN),
                        preferred_element_type=f32) + bvec(layer, FR_BF))

    # ---- Alternating-mask affine couplings (layer 0: identity=even, layer 1:
    # identity=odd), latent kept as two contiguous halves throughout.
    logdet = jnp.zeros((tb, 1), f32)
    for l in range(FLOW_LAYERS):
        x_id = z_e if l % 2 == 0 else z_o
        p = conditioner(x_id, l)                 # (TB, 32), first 8 cols valid
        shift = p[:, :D_HALF]
        scale = jax.nn.sigmoid(p[:, D_HALF:2 * D_HALF] + 2.0) + 1e-3
        if l % 2 == 0:
            z_o = z_o * scale + shift
        else:
            z_e = z_e * scale + shift
        logdet = logdet + jnp.sum(jnp.log(scale), axis=1, keepdims=True)

    z_pk = jnp.concatenate([z_e, z_o], axis=1)   # packed [even | odd]

    # ---- Decoder (dec_w1 rows pre-permuted to packed latent order); the big
    # (64, 256) matmul runs bf16 x bf16 with f32 accumulation.
    h1 = jnp.dot(z_pk, dw1_ref[...], preferred_element_type=f32) + db1_ref[...]
    h1 = jnp.maximum(h1, 0.0).astype(bf16)
    x_out = jnp.dot(h1, dw2_ref[...], preferred_element_type=f32) + db2_ref[...]

    # ---- Two aligned, unmasked lane-dense stores: 256-wide x_out, 128-wide tail.
    tail = jnp.concatenate(
        [enc, z_pk, logdet, jnp.zeros((tb, SLAB_W - OFF_PAD), f32)], axis=1)
    out_ref[:, OFF_XOUT:OFF_ENC] = x_out
    out_ref[:, OFF_ENC:SLAB_W] = tail


# ---------------------------------------------------------------------------
# Parameter folding: PyTorch-layout params -> kernel-ready dense matrices.
# ---------------------------------------------------------------------------
def fold_params(p):
    # Conv3x3(stride2, pad1) as a dense (H*W, Cout*HO*WO) matrix whose output
    # columns follow the PyTorch flatten order c*HO*WO + ho*WO + wo.
    cw = np.asarray(p["conv_w"], np.float32)
    conv_mat = np.zeros((H * W, CONV_COUT * HO * WO), np.float32)
    for c in range(CONV_COUT):
        for ho in range(HO):
            for wo in range(WO):
                col = c * HO * WO + ho * WO + wo
                for kh in range(3):
                    for kw in range(3):
                        hi, wi = ho * 2 - 1 + kh, wo * 2 - 1 + kw
                        if 0 <= hi < H and 0 <= wi < W:
                            conv_mat[hi * W + wi, col] = cw[c, 0, kh, kw]
    conv_bias = np.repeat(np.asarray(p["conv_b"], np.float32)[0], HO * WO)[None, :]

    # fc with mu columns packed [even | odd]; decoder rows in packed order.
    fc_w = np.asarray(p["fc_w"], np.float32)[:, COL_PERM]
    fc_b = np.asarray(p["fc_b"], np.float32)[:, COL_PERM]
    dec_w1 = np.asarray(p["dec_w1"], np.float32)[Z_PACK_PERM, :]

    # Pack all flow weights/biases of one layer into a single (176, 32) slab;
    # fold eval-BN scale into the residual-block linears.
    # TODO(synk): fold real per-feature BN running stats / gamma / beta here
    #             when loading a trained checkpoint.
    def pack_layer(lp):
        s = np.zeros((FLOW_ROWS, FLOW_HIDDEN), np.float32)
        s[FR_W0:FR_W0 + D_HALF, :] = np.asarray(lp["w0"])
        s[FR_W1A:FR_W1A + FLOW_HIDDEN, :] = BN_SCALE * np.asarray(lp["w1a"])
        s[FR_W1B:FR_W1B + FLOW_HIDDEN, :] = BN_SCALE * np.asarray(lp["w1b"])
        s[FR_W2A:FR_W2A + FLOW_HIDDEN, :] = BN_SCALE * np.asarray(lp["w2a"])
        s[FR_W2B:FR_W2B + FLOW_HIDDEN, :] = BN_SCALE * np.asarray(lp["w2b"])
        s[FR_WF:FR_WF + FLOW_HIDDEN, :2 * D_HALF] = np.asarray(lp["wf"])
        s[FR_B0, :] = np.asarray(lp["b0"])[0]
        s[FR_B1A, :] = np.asarray(lp["b1a"])[0]
        s[FR_B1B, :] = np.asarray(lp["b1b"])[0]
        s[FR_B2A, :] = np.asarray(lp["b2a"])[0]
        s[FR_B2B, :] = np.asarray(lp["b2b"])[0]
        s[FR_BF, :2 * D_HALF] = np.asarray(lp["bf"])[0]
        return s

    flow_pk = np.stack([pack_layer(lp) for lp in p["flow"]], axis=0)

    return dict(
        conv_mat=jnp.asarray(conv_mat, jnp.bfloat16),     # bf16 MXU operand
        conv_bias=jnp.asarray(conv_bias, jnp.float32),
        fc_w=jnp.asarray(fc_w, jnp.float32),
        fc_b=jnp.asarray(fc_b, jnp.float32),
        flow_pk=jnp.asarray(flow_pk, jnp.float32),
        dec_w1=jnp.asarray(dec_w1, jnp.float32),
        dec_b1=jnp.asarray(p["dec_b1"], jnp.float32),
        dec_w2=jnp.asarray(p["dec_w2"], jnp.bfloat16),    # bf16 MXU operand
        dec_b2=jnp.asarray(p["dec_b2"], jnp.float32),
    )


# ---------------------------------------------------------------------------
# Forward wrapper (single pallas_call + tiny slicing/un-permute glue)
# ---------------------------------------------------------------------------
def _pick_row_tile(n):
    """Largest 8-aligned batch-row tile <= MAX_ROW_TILE; when one full tile
    would cover the whole batch (grid == 1), split in two so v7x's second
    TensorCore also gets a grid step under dimension_semantics=('parallel',)."""
    n8 = ((n + 7) // 8) * 8
    if n8 >= 2 * MAX_ROW_TILE:
        return MAX_ROW_TILE
    if n8 >= MAX_ROW_TILE:
        return min(MAX_ROW_TILE, ((n8 + 15) // 16) * 8)   # ~half, 8-aligned
    return n8


def flow_vae_forward(x, kp):
    """Returns (z_0_mu_logvar, z_0_sampled, z_K_sampled, log_abs_det_jac, x_out)."""
    n = x.shape[0]
    x_flat = x.reshape(n, H * W).astype(jnp.float32)
    row_tile = _pick_row_tile(n)
    n_pad = ((n + row_tile - 1) // row_tile) * row_tile
    x_pad = jnp.zeros((n_pad, H * W), jnp.float32).at[:n].set(x_flat)

    inputs = (x_pad, kp["conv_mat"], kp["conv_bias"], kp["fc_w"], kp["fc_b"],
              kp["flow_pk"], kp["dec_w1"], kp["dec_b1"], kp["dec_w2"],
              kp["dec_b2"])

    def _rep_spec(a):  # full-array block, broadcast across the batch grid
        nd = a.ndim
        return pl.BlockSpec(a.shape, lambda i, _nd=nd: (0,) * _nd)

    in_specs = [pl.BlockSpec((row_tile, H * W), lambda i: (i, 0))]
    in_specs += [_rep_spec(a) for a in inputs[1:]]
    out_spec = pl.BlockSpec((row_tile, SLAB_W), lambda i: (i, 0))

    slab = pl.pallas_call(
        fused_flowvae_kernel,
        out_shape=jax.ShapeDtypeStruct((n_pad, SLAB_W), jnp.float32),
        grid=(n_pad // row_tile,),
        in_specs=in_specs,
        out_specs=out_spec,
        compiler_params=pltpu.CompilerParams(
            dimension_semantics=("parallel",),
            vmem_limit_bytes=32 * 1024 * 1024),
    )(*inputs)

    x_out = slab[:n, OFF_XOUT:OFF_ENC].reshape(n, 1, H, W)
    enc_packed = slab[:n, OFF_ENC:OFF_ZPK]
    z_packed = slab[:n, OFF_ZPK:OFF_LOGDET]
    log_abs_det_jac = slab[:n, OFF_LOGDET]

    z_0_mu_logvar = enc_packed[:, INV_COL_PERM].reshape(n, 2, DIM_Z)
    z_0_sampled = z_0_mu_logvar[:, 0, :]        # eval mode: z0 = mu0
    z_K_sampled = z_packed[:, INV_Z_PERM]
    # TODO(synk): training-mode reparameterization (mu + sigma*eps) not done.
    return z_0_mu_logvar, z_0_sampled, z_K_sampled, log_abs_det_jac, x_out


# ---------------------------------------------------------------------------
# Deterministic synthetic parameters (PyTorch layout)
# ---------------------------------------------------------------------------
def init_params(key):
    keys = iter(jax.random.split(key, 64))

    def nrm(shape, scale=0.1):
        return scale * jax.random.normal(next(keys), shape, jnp.float32)

    params = {
        "conv_w": nrm((CONV_COUT, 1, 3, 3)),
        "conv_b": nrm((1, CONV_COUT)),
        "fc_w": nrm((CONV_COUT * HO * WO, 2 * DIM_Z), 0.02),
        "fc_b": nrm((1, 2 * DIM_Z)),
        "dec_w1": nrm((DIM_Z, DEC_HIDDEN)),
        "dec_b1": nrm((1, DEC_HIDDEN)),
        "dec_w2": nrm((DEC_HIDDEN, DEC_OUT), 0.05),
        "dec_b2": nrm((1, DEC_OUT)),
        "flow": [],
    }
    for _ in range(FLOW_LAYERS):
        params["flow"].append({
            "w0": nrm((D_HALF, FLOW_HIDDEN)),
            "b0": nrm((1, FLOW_HIDDEN)),
            "w1a": nrm((FLOW_HIDDEN, FLOW_HIDDEN)),
            "b1a": nrm((1, FLOW_HIDDEN)),
            "w1b": nrm((FLOW_HIDDEN, FLOW_HIDDEN), 0.001),
            "b1b": nrm((1, FLOW_HIDDEN), 0.001),
            "w2a": nrm((FLOW_HIDDEN, FLOW_HIDDEN)),
            "b2a": nrm((1, FLOW_HIDDEN)),
            "w2b": nrm((FLOW_HIDDEN, FLOW_HIDDEN), 0.001),
            "b2b": nrm((1, FLOW_HIDDEN), 0.001),
            "wf": nrm((FLOW_HIDDEN, 2 * D_HALF)),
            "bf": nrm((1, 2 * D_HALF)),
        })
    return params


# ---------------------------------------------------------------------------
# Pure-JAX reference (mirrors the PyTorch eval forward; no Pallas, no folding)
# ---------------------------------------------------------------------------
def reference_forward(x, p):
    hi = jax.lax.Precision.HIGHEST
    n = x.shape[0]
    y = jax.lax.conv_general_dilated(
        x, p["conv_w"], window_strides=(2, 2), padding=((1, 1), (1, 1)),
        dimension_numbers=("NCHW", "OIHW", "NCHW"), precision=hi)
    y = jnp.maximum(y + p["conv_b"].reshape(1, CONV_COUT, 1, 1), 0.0)
    feat = y.reshape(n, CONV_COUT * HO * WO)
    enc = jnp.dot(feat, p["fc_w"], precision=hi) + p["fc_b"]
    z_mu_logvar = enc.reshape(n, 2, DIM_Z)
    z0 = z_mu_logvar[:, 0, :]
    z = z0
    logdet = jnp.zeros((n,), jnp.float32)
    for l, lp in enumerate(p["flow"]):
        ident = np.arange(l % 2, DIM_Z, 2)
        trans = np.arange(1 - l % 2, DIM_Z, 2)
        x_id, x_tr = z[:, ident], z[:, trans]
        h = jnp.dot(x_id, lp["w0"], precision=hi) + lp["b0"]
        for wa, ba, wb, bb in (("w1a", "b1a", "w1b", "b1b"),
                               ("w2a", "b2a", "w2b", "b2b")):
            t = jnp.maximum(h * BN_SCALE, 0.0)
            t = jnp.dot(t, lp[wa], precision=hi) + lp[ba]
            t = jnp.maximum(t * BN_SCALE, 0.0)
            t = jnp.dot(t, lp[wb], precision=hi) + lp[bb]
            h = h + t
        tp = jnp.dot(h, lp["wf"], precision=hi) + lp["bf"]
        shift, usc = tp[:, :D_HALF], tp[:, D_HALF:]
        scale = jax.nn.sigmoid(usc + 2.0) + 1e-3
        y_tr = x_tr * scale + shift
        z = jnp.zeros_like(z).at[:, ident].set(x_id).at[:, trans].set(y_tr)
        logdet = logdet + jnp.sum(jnp.log(scale), axis=1)
    h1 = jnp.maximum(jnp.dot(z, p["dec_w1"], precision=hi) + p["dec_b1"], 0.0)
    x_out = (jnp.dot(h1, p["dec_w2"], precision=hi) + p["dec_b2"]).reshape(n, 1, H, W)
    return z_mu_logvar, z0, z, logdet, x_out


if __name__ == "__main__":
    key = jax.random.PRNGKey(0)
    k_param, k_x1, k_x2 = jax.random.split(key, 3)
    params = init_params(k_param)
    kparams = fold_params(params)

    fwd = jax.jit(flow_vae_forward)

    # Single-channel 16x16 "spectrogram", batch of 2, NCHW like PyTorch.
    x = jax.random.normal(k_x1, (2, 1, H, W), jnp.float32)
    outs = jax.block_until_ready(fwd(x, kparams))
    z_0_mu_logvar, z_0_sampled, z_K_sampled, log_abs_det_jac, x_out = outs

    assert z_0_mu_logvar.shape == (2, 2, DIM_Z)
    assert z_0_sampled.shape == (2, DIM_Z)
    assert z_K_sampled.shape == (2, DIM_Z)
    assert log_abs_det_jac.shape == (2,)
    assert x_out.shape == (2, 1, H, W)
    assert all(bool(jnp.all(jnp.isfinite(o))) for o in outs)

    refs = reference_forward(x, params)
    for got, ref in zip(outs, refs):
        np.testing.assert_allclose(np.asarray(got), np.asarray(ref),
                                   rtol=2e-2, atol=2e-2)

    # Larger batch: exercises big row tiles, batch padding, and a >=2-step grid.
    x_big = jax.random.normal(k_x2, (300, 1, H, W), jnp.float32)
    outs_big = jax.block_until_ready(fwd(x_big, kparams))
    refs_big = reference_forward(x_big, params)
    for got, ref in zip(outs_big, refs_big):
        np.testing.assert_allclose(np.asarray(got), np.asarray(ref),
                                   rtol=2e-2, atol=2e-2)

    print("KERNEL_OK")
</pallas_src>

<mosaic_0001>
module attributes {stable_mosaic.version = 11 : i64} {
  func.func @fused_flowvae_kernel(%arg0: i32, %arg1: memref<8x256xf32, #tpu.memory_space<vmem>>, %arg2: memref<256x512xbf16, #tpu.memory_space<vmem>>, %arg3: memref<1x512xf32, #tpu.memory_space<vmem>>, %arg4: memref<512x16xf32, #tpu.memory_space<vmem>>, %arg5: memref<1x16xf32, #tpu.memory_space<vmem>>, %arg6: memref<2x176x32xf32, #tpu.memory_space<vmem>>, %arg7: memref<8x64xf32, #tpu.memory_space<vmem>>, %arg8: memref<1x64xf32, #tpu.memory_space<vmem>>, %arg9: memref<64x256xbf16, #tpu.memory_space<vmem>>, %arg10: memref<1x256xf32, #tpu.memory_space<vmem>>, %arg11: memref<8x384xf32, #tpu.memory_space<vmem>>) attributes {dimension_semantics = [#tpu.dimension_semantics<parallel>], iteration_bounds = array<i64: 1>, scalar_prefetch = 0 : i64, scratch_operands = 0 : i64, tpu.core_type = #tpu.core_type<tc>, window_params = [{transform_indices = @transform_0, window_bounds = array<i64: 8, 256>}, {pipeline_mode = #tpu.pipeline_mode<synchronous>, transform_indices = @transform_1, window_bounds = array<i64: 256, 512>}, {pipeline_mode = #tpu.pipeline_mode<synchronous>, transform_indices = @transform_2, window_bounds = array<i64: 1, 512>}, {pipeline_mode = #tpu.pipeline_mode<synchronous>, transform_indices = @transform_3, window_bounds = array<i64: 512, 16>}, {pipeline_mode = #tpu.pipeline_mode<synchronous>, transform_indices = @transform_4, window_bounds = array<i64: 1, 16>}, {pipeline_mode = #tpu.pipeline_mode<synchronous>, transform_indices = @transform_5, window_bounds = array<i64: 2, 176, 32>}, {pipeline_mode = #tpu.pipeline_mode<synchronous>, transform_indices = @transform_6, window_bounds = array<i64: 8, 64>}, {pipeline_mode = #tpu.pipeline_mode<synchronous>, transform_indices = @transform_7, window_bounds = array<i64: 1, 64>}, {pipeline_mode = #tpu.pipeline_mode<synchronous>, transform_indices = @transform_8, window_bounds = array<i64: 64, 256>}, {pipeline_mode = #tpu.pipeline_mode<synchronous>, transform_indices = @transform_9, window_bounds = array<i64: 1, 256>}, {transform_indices = @transform_10, window_bounds = array<i64: 8, 384>}]} {
    %c0 = arith.constant 0 : index
    %c0_0 = arith.constant 0 : index
    %0 = vector.load %arg1[%c0, %c0_0] : memref<8x256xf32, #tpu.memory_space<vmem>>, vector<8x256xf32>
    %1 = arith.truncf %0 : vector<8x256xf32> to vector<8x256xbf16>
    %c0_1 = arith.constant 0 : index
    %c0_2 = arith.constant 0 : index
    %2 = vector.load %arg2[%c0_1, %c0_2] : memref<256x512xbf16, #tpu.memory_space<vmem>>, vector<256x512xbf16>
    %cst = arith.constant dense<0.000000e+00> : vector<8x512xf32>
    %3 = tpu.matmul %1, %2, %cst {dimension_numbers = #tpu.dot_dimension_numbers<[1], [0], [0], [1], [0, 0, 1, 1], [], []>} : vector<8x256xbf16>, vector<256x512xbf16>, vector<8x512xf32> -> vector<8x512xf32>
    %c0_3 = arith.constant 0 : index
    %c0_4 = arith.constant 0 : index
    %4 = vector.load %arg3[%c0_3, %c0_4] : memref<1x512xf32, #tpu.memory_space<vmem>>, vector<1x512xf32>
    %5 = vector.broadcast %4 : vector<1x512xf32> to vector<8x512xf32>
    %6 = arith.addf %3, %5 : vector<8x512xf32>
    %cst_5 = arith.constant 0.000000e+00 : f32
    %7 = vector.broadcast %cst_5 : f32 to vector<8x512xf32>
    %8 = arith.maximumf %6, %7 : vector<8x512xf32>
    %c0_6 = arith.constant 0 : index
    %c0_7 = arith.constant 0 : index
    %9 = vector.load %arg4[%c0_6, %c0_7] : memref<512x16xf32, #tpu.memory_space<vmem>>, vector<512x16xf32>
    %cst_8 = arith.constant dense<0.000000e+00> : vector<8x16xf32>
    %10 = tpu.matmul %8, %9, %cst_8 {dimension_numbers = #tpu.dot_dimension_numbers<[1], [0], [0], [1], [0, 0, 1, 1], [], []>} : vector<8x512xf32>, vector<512x16xf32>, vector<8x16xf32> -> vector<8x16xf32>
    %c0_9 = arith.constant 0 : index
    %c0_10 = arith.constant 0 : index
    %11 = vector.load %arg5[%c0_9, %c0_10] : memref<1x16xf32, #tpu.memory_space<vmem>>, vector<1x16xf32>
    %12 = vector.broadcast %11 : vector<1x16xf32> to vector<8x16xf32>
    %13 = arith.addf %10, %12 : vector<8x16xf32>
    %14 = vector.extract_strided_slice %13 {offsets = [0, 0], sizes = [8, 4], strides = [1, 1]} : vector<8x16xf32> to vector<8x4xf32>
    %15 = vector.extract_strided_slice %13 {offsets = [0, 4], sizes = [8, 4], strides = [1, 1]} : vector<8x16xf32> to vector<8x4xf32>
    %cst_11 = arith.constant 0.000000e+00 : f32
    %16 = vector.broadcast %cst_11 : f32 to vector<8x1xf32>
    %c0_12 = arith.constant 0 : index
    %c0_13 = arith.constant 0 : index
    %c0_14 = arith.constant 0 : index
    %17 = vector.load %arg6[%c0_12, %c0_13, %c0_14] : memref<2x176x32xf32, #tpu.memory_space<vmem>>, vector<1x4x32xf32>
    %18 = vector.shape_cast %17 : vector<1x4x32xf32> to vector<4x32xf32>
    %cst_15 = arith.constant dense<0.000000e+00> : vector<8x32xf32>
    %19 = tpu.matmul %14, %18, %cst_15 {dimension_numbers = #tpu.dot_dimension_numbers<[1], [0], [0], [1], [0, 0, 1, 1], [], []>} : vector<8x4xf32>, vector<4x32xf32>, vector<8x32xf32> -> vector<8x32xf32>
    %c0_16 = arith.constant 0 : index
    %c168 = arith.constant 168 : index
    %c0_17 = arith.constant 0 : index
    %20 = vector.load %arg6[%c0_16, %c168, %c0_17] : memref<2x176x32xf32, #tpu.memory_space<vmem>>, vector<1x1x32xf32>
    %21 = vector.shape_cast %20 : vector<1x1x32xf32> to vector<1x32xf32>
    %22 = vector.broadcast %21 : vector<1x32xf32> to vector<8x32xf32>
    %23 = arith.addf %19, %22 : vector<8x32xf32>
    %cst_18 = arith.constant 0.000000e+00 : f32
    %24 = vector.broadcast %cst_18 : f32 to vector<8x32xf32>
    %25 = arith.maximumf %23, %24 : vector<8x32xf32>
    %c0_19 = arith.constant 0 : index
    %c8 = arith.constant 8 : index
    %c0_20 = arith.constant 0 : index
    %26 = vector.load %arg6[%c0_19, %c8, %c0_20] : memref<2x176x32xf32, #tpu.memory_space<vmem>>, vector<1x32x32xf32>
    %27 = vector.shape_cast %26 : vector<1x32x32xf32> to vector<32x32xf32>
    %cst_21 = arith.constant dense<0.000000e+00> : vector<8x32xf32>
    %28 = tpu.matmul %25, %27, %cst_21 {dimension_numbers = #tpu.dot_dimension_numbers<[1], [0], [0], [1], [0, 0, 1, 1], [], []>} : vector<8x32xf32>, vector<32x32xf32>, vector<8x32xf32> -> vector<8x32xf32>
    %c0_22 = arith.constant 0 : index
    %c169 = arith.constant 169 : index
    %c0_23 = arith.constant 0 : index
    %29 = vector.load %arg6[%c0_22, %c169, %c0_23] : memref<2x176x32xf32, #tpu.memory_space<vmem>>, vector<1x1x32xf32>
    %30 = vector.shape_cast %29 : vector<1x1x32xf32> to vector<1x32xf32>
    %31 = vector.broadcast %30 : vector<1x32xf32> to vector<8x32xf32>
    %32 = arith.addf %28, %31 : vector<8x32xf32>
    %cst_24 = arith.constant 0.000000e+00 : f32
    %33 = vector.broadcast %cst_24 : f32 to vector<8x32xf32>
    %34 = arith.maximumf %32, %33 : vector<8x32xf32>
    %c0_25 = arith.constant 0 : index
    %c40 = arith.constant 40 : index
    %c0_26 = arith.constant 0 : index
    %35 = vector.load %arg6[%c0_25, %c40, %c0_26] : memref<2x176x32xf32, #tpu.memory_space<vmem>>, vector<1x32x32xf32>
    %36 = vector.shape_cast %35 : vector<1x32x32xf32> to vector<32x32xf32>
    %cst_27 = arith.constant dense<0.000000e+00> : vector<8x32xf32>
    %37 = tpu.matmul %34, %36, %cst_27 {dimension_numbers = #tpu.dot_dimension_numbers<[1], [0], [0], [1], [0, 0, 1, 1], [], []>} : vector<8x32xf32>, vector<32x32xf32>, vector<8x32xf32> -> vector<8x32xf32>
    %c0_28 = arith.constant 0 : index
    %c170 = arith.constant 170 : index
    %c0_29 = arith.constant 0 : index
    %38 = vector.load %arg6[%c0_28, %c170, %c0_29] : memref<2x176x32xf32, #tpu.memory_space<vmem>>, vector<1x1x32xf32>
    %39 = vector.shape_cast %38 : vector<1x1x32xf32> to vector<1x32xf32>
    %40 = vector.broadcast %39 : vector<1x32xf32> to vector<8x32xf32>
    %41 = arith.addf %37, %40 : vector<8x32xf32>
    %42 = arith.addf %23, %41 : vector<8x32xf32>
    %cst_30 = arith.constant 0.000000e+00 : f32
    %43 = vector.broadcast %cst_30 : f32 to vector<8x32xf32>
    %44 = arith.maximumf %42, %43 : vector<8x32xf32>
    %c0_31 = arith.constant 0 : index
    %c72 = arith.constant 72 : index
    %c0_32 = arith.constant 0 : index
    %45 = vector.load %arg6[%c0_31, %c72, %c0_32] : memref<2x176x32xf32, #tpu.memory_space<vmem>>, vector<1x32x32xf32>
    %46 = vector.shape_cast %45 : vector<1x32x32xf32> to vector<32x32xf32>
    %cst_33 = arith.constant dense<0.000000e+00> : vector<8x32xf32>
    %47 = tpu.matmul %44, %46, %cst_33 {dimension_numbers = #tpu.dot_dimension_numbers<[1], [0], [0], [1], [0, 0, 1, 1], [], []>} : vector<8x32xf32>, vector<32x32xf32>, vector<8x32xf32> -> vector<8x32xf32>
    %c0_34 = arith.constant 0 : index
    %c171 = arith.constant 171 : index
    %c0_35 = arith.constant 0 : index
    %48 = vector.load %arg6[%c0_34, %c171, %c0_35] : memref<2x176x32xf32, #tpu.memory_space<vmem>>, vector<1x1x32xf32>
    %49 = vector.shape_cast %48 : vector<1x1x32xf32> to vector<1x32xf32>
    %50 = vector.broadcast %49 : vector<1x32xf32> to vector<8x32xf32>
    %51 = arith.addf %47, %50 : vector<8x32xf32>
    %cst_36 = arith.constant 0.000000e+00 : f32
    %52 = vector.broadcast %cst_36 : f32 to vector<8x32xf32>
    %53 = arith.maximumf %51, %52 : vector<8x32xf32>
    %c0_37 = arith.constant 0 : index
    %c104 = arith.constant 104 : index
    %c0_38 = arith.constant 0 : index
    %54 = vector.load %arg6[%c0_37, %c104, %c0_38] : memref<2x176x32xf32, #tpu.memory_space<vmem>>, vector<1x32x32xf32>
    %55 = vector.shape_cast %54 : vector<1x32x32xf32> to vector<32x32xf32>
    %cst_39 = arith.constant dense<0.000000e+00> : vector<8x32xf32>
    %56 = tpu.matmul %53, %55, %cst_39 {dimension_numbers = #tpu.dot_dimension_numbers<[1], [0], [0], [1], [0, 0, 1, 1], [], []>} : vector<8x32xf32>, vector<32x32xf32>, vector<8x32xf32> -> vector<8x32xf32>
    %c0_40 = arith.constant 0 : index
    %c172 = arith.constant 172 : index
    %c0_41 = arith.constant 0 : index
    %57 = vector.load %arg6[%c0_40, %c172, %c0_41] : memref<2x176x32xf32, #tpu.memory_space<vmem>>, vector<1x1x32xf32>
    %58 = vector.shape_cast %57 : vector<1x1x32xf32> to vector<1x32xf32>
    %59 = vector.broadcast %58 : vector<1x32xf32> to vector<8x32xf32>
    %60 = arith.addf %56, %59 : vector<8x32xf32>
    %61 = arith.addf %42, %60 : vector<8x32xf32>
    %c0_42 = arith.constant 0 : index
    %c136 = arith.constant 136 : index
    %c0_43 = arith.constant 0 : index
    %62 = vector.load %arg6[%c0_42, %c136, %c0_43] : memref<2x176x32xf32, #tpu.memory_space<vmem>>, vector<1x32x32xf32>
    %63 = vector.shape_cast %62 : vector<1x32x32xf32> to vector<32x32xf32>
    %cst_44 = arith.constant dense<0.000000e+00> : vector<8x32xf32>
    %64 = tpu.matmul %61, %63, %cst_44 {dimension_numbers = #tpu.dot_dimension_numbers<[1], [0], [0], [1], [0, 0, 1, 1], [], []>} : vector<8x32xf32>, vector<32x32xf32>, vector<8x32xf32> -> vector<8x32xf32>
    %c0_45 = arith.constant 0 : index
    %c173 = arith.constant 173 : index
    %c0_46 = arith.constant 0 : index
    %65 = vector.load %arg6[%c0_45, %c173, %c0_46] : memref<2x176x32xf32, #tpu.memory_space<vmem>>, vector<1x1x32xf32>
    %66 = vector.shape_cast %65 : vector<1x1x32xf32> to vector<1x32xf32>
    %67 = vector.broadcast %66 : vector<1x32xf32> to vector<8x32xf32>
    %68 = arith.addf %64, %67 : vector<8x32xf32>
    %69 = vector.extract_strided_slice %68 {offsets = [0, 0], sizes = [8, 4], strides = [1, 1]} : vector<8x32xf32> to vector<8x4xf32>
    %70 = vector.extract_strided_slice %68 {offsets = [0, 4], sizes = [8, 4], strides = [1, 1]} : vector<8x32xf32> to vector<8x4xf32>
    %cst_47 = arith.constant 2.000000e+00 : f32
    %71 = vector.broadcast %cst_47 : f32 to vector<8x4xf32>
    %72 = arith.addf %70, %71 : vector<8x4xf32>
    %73 = arith.negf %72 : vector<8x4xf32>
    %74 = math.exp %73 : vector<8x4xf32>
    %cst_48 = arith.constant 1.000000e+00 : f32
    %75 = vector.broadcast %cst_48 : f32 to vector<8x4xf32>
    %76 = arith.addf %75, %74 : vector<8x4xf32>
    %77 = arith.divf %75, %76 : vector<8x4xf32>
    %cst_49 = arith.constant 1.000000e-03 : f32
    %78 = vector.broadcast %cst_49 : f32 to vector<8x4xf32>
    %79 = arith.addf %77, %78 : vector<8x4xf32>
    %80 = arith.mulf %15, %79 : vector<8x4xf32>
    %81 = arith.addf %80, %69 : vector<8x4xf32>
    %82 = math.log %79 : vector<8x4xf32>
    %cst_50 = arith.constant dense<0.000000e+00> : vector<8xf32>
    %83 = vector.multi_reduction <add>, %82, %cst_50 [1] : vector<8x4xf32> to vector<8xf32>
    %84 = vector.shape_cast %83 : vector<8xf32> to vector<8x1xf32>
    %85 = arith.addf %16, %84 : vector<8x1xf32>
    %c1 = arith.constant 1 : index
    %c0_51 = arith.constant 0 : index
    %c0_52 = arith.constant 0 : index
    %86 = vector.load %arg6[%c1, %c0_51, %c0_52] : memref<2x176x32xf32, #tpu.memory_space<vmem>>, vector<1x4x32xf32>
    %87 = vector.shape_cast %86 : vector<1x4x32xf32> to vector<4x32xf32>
    %cst_53 = arith.constant dense<0.000000e+00> : vector<8x32xf32>
    %88 = tpu.matmul %81, %87, %cst_53 {dimension_numbers = #tpu.dot_dimension_numbers<[1], [0], [0], [1], [0, 0, 1, 1], [], []>} : vector<8x4xf32>, vector<4x32xf32>, vector<8x32xf32> -> vector<8x32xf32>
    %c1_54 = arith.constant 1 : index
    %c168_55 = arith.constant 168 : index
    %c0_56 = arith.constant 0 : index
    %89 = vector.load %arg6[%c1_54, %c168_55, %c0_56] : memref<2x176x32xf32, #tpu.memory_space<vmem>>, vector<1x1x32xf32>
    %90 = vector.shape_cast %89 : vector<1x1x32xf32> to vector<1x32xf32>
    %91 = vector.broadcast %90 : vector<1x32xf32> to vector<8x32xf32>
    %92 = arith.addf %88, %91 : vector<8x32xf32>
    %cst_57 = arith.constant 0.000000e+00 : f32
    %93 = vector.broadcast %cst_57 : f32 to vector<8x32xf32>
    %94 = arith.maximumf %92, %93 : vector<8x32xf32>
    %c1_58 = arith.constant 1 : index
    %c8_59 = arith.constant 8 : index
    %c0_60 = arith.constant 0 : index
    %95 = vector.load %arg6[%c1_58, %c8_59, %c0_60] : memref<2x176x32xf32, #tpu.memory_space<vmem>>, vector<1x32x32xf32>
    %96 = vector.shape_cast %95 : vector<1x32x32xf32> to vector<32x32xf32>
    %cst_61 = arith.constant dense<0.000000e+00> : vector<8x32xf32>
    %97 = tpu.matmul %94, %96, %cst_61 {dimension_numbers = #tpu.dot_dimension_numbers<[1], [0], [0], [1], [0, 0, 1, 1], [], []>} : vector<8x32xf32>, vector<32x32xf32>, vector<8x32xf32> -> vector<8x32xf32>
    %c1_62 = arith.constant 1 : index
    %c169_63 = arith.constant 169 : index
    %c0_64 = arith.constant 0 : index
    %98 = vector.load %arg6[%c1_62, %c169_63, %c0_64] : memref<2x176x32xf32, #tpu.memory_space<vmem>>, vector<1x1x32xf32>
    %99 = vector.shape_cast %98 : vector<1x1x32xf32> to vector<1x32xf32>
    %100 = vector.broadcast %99 : vector<1x32xf32> to vector<8x32xf32>
    %101 = arith.addf %97, %100 : vector<8x32xf32>
    %cst_65 = arith.constant 0.000000e+00 : f32
    %102 = vector.broadcast %cst_65 : f32 to vector<8x32xf32>
    %103 = arith.maximumf %101, %102 : vector<8x32xf32>
    %c1_66 = arith.constant 1 : index
    %c40_67 = arith.constant 40 : index
    %c0_68 = arith.constant 0 : index
    %104 = vector.load %arg6[%c1_66, %c40_67, %c0_68] : memref<2x176x32xf32, #tpu.memory_space<vmem>>, vector<1x32x32xf32>
    %105 = vector.shape_cast %104 : vector<1x32x32xf32> to vector<32x32xf32>
    %cst_69 = arith.constant dense<0.000000e+00> : vector<8x32xf32>
    %106 = tpu.matmul %103, %105, %cst_69 {dimension_numbers = #tpu.dot_dimension_numbers<[1], [0], [0], [1], [0, 0, 1, 1], [], []>} : vector<8x32xf32>, vector<32x32xf32>, vector<8x32xf32> -> vector<8x32xf32>
    %c1_70 = arith.constant 1 : index
    %c170_71 = arith.constant 170 : index
    %c0_72 = arith.constant 0 : index
    %107 = vector.load %arg6[%c1_70, %c170_71, %c0_72] : memref<2x176x32xf32, #tpu.memory_space<vmem>>, vector<1x1x32xf32>
    %108 = vector.shape_cast %107 : vector<1x1x32xf32> to vector<1x32xf32>
    %109 = vector.broadcast %108 : vector<1x32xf32> to vector<8x32xf32>
    %110 = arith.addf %106, %109 : vector<8x32xf32>
    %111 = arith.addf %92, %110 : vector<8x32xf32>
    %cst_73 = arith.constant 0.000000e+00 : f32
    %112 = vector.broadcast %cst_73 : f32 to vector<8x32xf32>
    %113 = arith.maximumf %111, %112 : vector<8x32xf32>
    %c1_74 = arith.constant 1 : index
    %c72_75 = arith.constant 72 : index
    %c0_76 = arith.constant 0 : index
    %114 = vector.load %arg6[%c1_74, %c72_75, %c0_76] : memref<2x176x32xf32, #tpu.memory_space<vmem>>, vector<1x32x32xf32>
    %115 = vector.shape_cast %114 : vector<1x32x32xf32> to vector<32x32xf32>
    %cst_77 = arith.constant dense<0.000000e+00> : vector<8x32xf32>
    %116 = tpu.matmul %113, %115, %cst_77 {dimension_numbers = #tpu.dot_dimension_numbers<[1], [0], [0], [1], [0, 0, 1, 1], [], []>} : vector<8x32xf32>, vector<32x32xf32>, vector<8x32xf32> -> vector<8x32xf32>
    %c1_78 = arith.constant 1 : index
    %c171_79 = arith.constant 171 : index
    %c0_80 = arith.constant 0 : index
    %117 = vector.load %arg6[%c1_78, %c171_79, %c0_80] : memref<2x176x32xf32, #tpu.memory_space<vmem>>, vector<1x1x32xf32>
    %118 = vector.shape_cast %117 : vector<1x1x32xf32> to vector<1x32xf32>
    %119 = vector.broadcast %118 : vector<1x32xf32> to vector<8x32xf32>
    %120 = arith.addf %116, %119 : vector<8x32xf32>
    %cst_81 = arith.constant 0.000000e+00 : f32
    %121 = vector.broadcast %cst_81 : f32 to vector<8x32xf32>
    %122 = arith.maximumf %120, %121 : vector<8x32xf32>
    %c1_82 = arith.constant 1 : index
    %c104_83 = arith.constant 104 : index
    %c0_84 = arith.constant 0 : index
    %123 = vector.load %arg6[%c1_82, %c104_83, %c0_84] : memref<2x176x32xf32, #tpu.memory_space<vmem>>, vector<1x32x32xf32>
    %124 = vector.shape_cast %123 : vector<1x32x32xf32> to vector<32x32xf32>
    %cst_85 = arith.constant dense<0.000000e+00> : vector<8x32xf32>
    %125 = tpu.matmul %122, %124, %cst_85 {dimension_numbers = #tpu.dot_dimension_numbers<[1], [0], [0], [1], [0, 0, 1, 1], [], []>} : vector<8x32xf32>, vector<32x32xf32>, vector<8x32xf32> -> vector<8x32xf32>
    %c1_86 = arith.constant 1 : index
    %c172_87 = arith.constant 172 : index
    %c0_88 = arith.constant 0 : index
    %126 = vector.load %arg6[%c1_86, %c172_87, %c0_88] : memref<2x176x32xf32, #tpu.memory_space<vmem>>, vector<1x1x32xf32>
    %127 = vector.shape_cast %126 : vector<1x1x32xf32> to vector<1x32xf32>
    %128 = vector.broadcast %127 : vector<1x32xf32> to vector<8x32xf32>
    %129 = arith.addf %125, %128 : vector<8x32xf32>
    %130 = arith.addf %111, %129 : vector<8x32xf32>
    %c1_89 = arith.constant 1 : index
    %c136_90 = arith.constant 136 : index
    %c0_91 = arith.constant 0 : index
    %131 = vector.load %arg6[%c1_89, %c136_90, %c0_91] : memref<2x176x32xf32, #tpu.memory_space<vmem>>, vector<1x32x32xf32>
    %132 = vector.shape_cast %131 : vector<1x32x32xf32> to vector<32x32xf32>
    %cst_92 = arith.constant dense<0.000000e+00> : vector<8x32xf32>
    %133 = tpu.matmul %130, %132, %cst_92 {dimension_numbers = #tpu.dot_dimension_numbers<[1], [0], [0], [1], [0, 0, 1, 1], [], []>} : vector<8x32xf32>, vector<32x32xf32>, vector<8x32xf32> -> vector<8x32xf32>
    %c1_93 = arith.constant 1 : index
    %c173_94 = arith.constant 173 : index
    %c0_95 = arith.constant 0 : index
    %134 = vector.load %arg6[%c1_93, %c173_94, %c0_95] : memref<2x176x32xf32, #tpu.memory_space<vmem>>, vector<1x1x32xf32>
    %135 = vector.shape_cast %134 : vector<1x1x32xf32> to vector<1x32xf32>
    %136 = vector.broadcast %135 : vector<1x32xf32> to vector<8x32xf32>
    %137 = arith.addf %133, %136 : vector<8x32xf32>
    %138 = vector.extract_strided_slice %137 {offsets = [0, 0], sizes = [8, 4], strides = [1, 1]} : vector<8x32xf32> to vector<8x4xf32>
    %139 = vector.extract_strided_slice %137 {offsets = [0, 4], sizes = [8, 4], strides = [1, 1]} : vector<8x32xf32> to vector<8x4xf32>
    %cst_96 = arith.constant 2.000000e+00 : f32
    %140 = vector.broadcast %cst_96 : f32 to vector<8x4xf32>
    %141 = arith.addf %139, %140 : vector<8x4xf32>
    %142 = arith.negf %141 : vector<8x4xf32>
    %143 = math.exp %142 : vector<8x4xf32>
    %cst_97 = arith.constant 1.000000e+00 : f32
    %144 = vector.broadcast %cst_97 : f32 to vector<8x4xf32>
    %145 = arith.addf %144, %143 : vector<8x4xf32>
    %146 = arith.divf %144, %145 : vector<8x4xf32>
    %cst_98 = arith.constant 1.000000e-03 : f32
    %147 = vector.broadcast %cst_98 : f32 to vector<8x4xf32>
    %148 = arith.addf %146, %147 : vector<8x4xf32>
    %149 = arith.mulf %14, %148 : vector<8x4xf32>
    %150 = arith.addf %149, %138 : vector<8x4xf32>
    %151 = math.log %148 : vector<8x4xf32>
    %cst_99 = arith.constant dense<0.000000e+00> : vector<8xf32>
    %152 = vector.multi_reduction <add>, %151, %cst_99 [1] : vector<8x4xf32> to vector<8xf32>
    %153 = vector.shape_cast %152 : vector<8xf32> to vector<8x1xf32>
    %154 = arith.addf %85, %153 : vector<8x1xf32>
    %155 = tpu.concatenate %150, %81 in 1 : vector<8x4xf32>, vector<8x4xf32> -> vector<8x8xf32>
    %c0_100 = arith.constant 0 : index
    %c0_101 = arith.constant 0 : index
    %156 = vector.load %arg7[%c0_100, %c0_101] : memref<8x64xf32, #tpu.memory_space<vmem>>, vector<8x64xf32>
    %cst_102 = arith.constant dense<0.000000e+00> : vector<8x64xf32>
    %157 = tpu.matmul %155, %156, %cst_102 {dimension_numbers = #tpu.dot_dimension_numbers<[1], [0], [0], [1], [0, 0, 1, 1], [], []>} : vector<8x8xf32>, vector<8x64xf32>, vector<8x64xf32> -> vector<8x64xf32>
    %c0_103 = arith.constant 0 : index
    %c0_104 = arith.constant 0 : index
    %158 = vector.load %arg8[%c0_103, %c0_104] : memref<1x64xf32, #tpu.memory_space<vmem>>, vector<1x64xf32>
    %159 = vector.broadcast %158 : vector<1x64xf32> to vector<8x64xf32>
    %160 = arith.addf %157, %159 : vector<8x64xf32>
    %cst_105 = arith.constant 0.000000e+00 : f32
    %161 = vector.broadcast %cst_105 : f32 to vector<8x64xf32>
    %162 = arith.maximumf %160, %161 : vector<8x64xf32>
    %163 = arith.truncf %162 : vector<8x64xf32> to vector<8x64xbf16>
    %c0_106 = arith.constant 0 : index
    %c0_107 = arith.constant 0 : index
    %164 = vector.load %arg9[%c0_106, %c0_107] : memref<64x256xbf16, #tpu.memory_space<vmem>>, vector<64x256xbf16>
    %cst_108 = arith.constant dense<0.000000e+00> : vector<8x256xf32>
    %165 = tpu.matmul %163, %164, %cst_108 {dimension_numbers = #tpu.dot_dimension_numbers<[1], [0], [0], [1], [0, 0, 1, 1], [], []>} : vector<8x64xbf16>, vector<64x256xbf16>, vector<8x256xf32> -> vector<8x256xf32>
    %c0_109 = arith.constant 0 : index
    %c0_110 = arith.constant 0 : index
    %166 = vector.load %arg10[%c0_109, %c0_110] : memref<1x256xf32, #tpu.memory_space<vmem>>, vector<1x256xf32>
    %167 = vector.broadcast %166 : vector<1x256xf32> to vector<8x256xf32>
    %168 = arith.addf %165, %167 : vector<8x256xf32>
    %cst_111 = arith.constant 0.000000e+00 : f32
    %169 = vector.broadcast %cst_111 : f32 to vector<8x103xf32>
    %170 = tpu.concatenate %13, %155, %154, %169 in 1 : vector<8x16xf32>, vector<8x8xf32>, vector<8x1xf32>, vector<8x103xf32> -> vector<8x128xf32>
    %c0_112 = arith.constant 0 : index
    %c0_113 = arith.constant 0 : index
    %171 = vector.load %arg11[%c0_112, %c0_113] : memref<8x384xf32, #tpu.memory_space<vmem>>, vector<8x256xf32>
    tpu.vector_store %arg11[%c0_112, %c0_113], %168 {strides = array<i32>} : memref<8x384xf32, #tpu.memory_space<vmem>>, vector<8x256xf32>,
    %c0_114 = arith.constant 0 : index
    %c256 = arith.constant 256 : index
    %172 = vector.load %arg11[%c0_114, %c256] : memref<8x384xf32, #tpu.memory_space<vmem>>, vector<8x128xf32>
    tpu.vector_store %arg11[%c0_114, %c256], %170 {strides = array<i32>} : memref<8x384xf32, #tpu.memory_space<vmem>>, vector<8x128xf32>,
    return
  }
  func.func @transform_0(%arg0: i32) -> (i32, i32) {
    %c0_i32 = arith.constant 0 : i32
    %c0_i32_0 = arith.constant 0 : i32
    return %arg0, %c0_i32 : i32, i32
  }
  func.func @transform_1(%arg0: i32) -> (i32, i32) {
    %c0_i32 = arith.constant 0 : i32
    %c0_i32_0 = arith.constant 0 : i32
    %c0_i32_1 = arith.constant 0 : i32
    return %c0_i32, %c0_i32_0 : i32, i32
  }
  func.func @transform_2(%arg0: i32) -> (i32, i32) {
    %c0_i32 = arith.constant 0 : i32
    %c0_i32_0 = arith.constant 0 : i32
    %c0_i32_1 = arith.constant 0 : i32
    return %c0_i32, %c0_i32_0 : i32, i32
  }
  func.func @transform_3(%arg0: i32) -> (i32, i32) {
    %c0_i32 = arith.constant 0 : i32
    %c0_i32_0 = arith.constant 0 : i32
    %c0_i32_1 = arith.constant 0 : i32
    return %c0_i32, %c0_i32_0 : i32, i32
  }
  func.func @transform_4(%arg0: i32) -> (i32, i32) {
    %c0_i32 = arith.constant 0 : i32
    %c0_i32_0 = arith.constant 0 : i32
    %c0_i32_1 = arith.constant 0 : i32
    return %c0_i32, %c0_i32_0 : i32, i32
  }
  func.func @transform_5(%arg0: i32) -> (i32, i32, i32) {
    %c0_i32 = arith.constant 0 : i32
    %c0_i32_0 = arith.constant 0 : i32
    %c0_i32_1 = arith.constant 0 : i32
    %c0_i32_2 = arith.constant 0 : i32
    return %c0_i32, %c0_i32_0, %c0_i32_1 : i32, i32, i32
  }
  func.func @transform_6(%arg0: i32) -> (i32, i32) {
    %c0_i32 = arith.constant 0 : i32
    %c0_i32_0 = arith.constant 0 : i32
    %c0_i32_1 = arith.constant 0 : i32
    return %c0_i32, %c0_i32_0 : i32, i32
  }
  func.func @transform_7(%arg0: i32) -> (i32, i32) {
    %c0_i32 = arith.constant 0 : i32
    %c0_i32_0 = arith.constant 0 : i32
    %c0_i32_1 = arith.constant 0 : i32
    return %c0_i32, %c0_i32_0 : i32, i32
  }
  func.func @transform_8(%arg0: i32) -> (i32, i32) {
    %c0_i32 = arith.constant 0 : i32
    %c0_i32_0 = arith.constant 0 : i32
    %c0_i32_1 = arith.constant 0 : i32
    return %c0_i32, %c0_i32_0 : i32, i32
  }
  func.func @transform_9(%arg0: i32) -> (i32, i32) {
    %c0_i32 = arith.constant 0 : i32
    %c0_i32_0 = arith.constant 0 : i32
    %c0_i32_1 = arith.constant 0 : i32
    return %c0_i32, %c0_i32_0 : i32, i32
  }
  func.func @transform_10(%arg0: i32) -> (i32, i32) {
    %c0_i32 = arith.constant 0 : i32
    %c0_i32_0 = arith.constant 0 : i32
    return %arg0, %c0_i32 : i32, i32
  }
}

</mosaic_0001>

<bundles_post_ra>
// kernel: flow_vae_forward.1
= control target key start
LH: loop header
LB: loop body
LE: loop exit
PB: predicated region body
PF: predicated region fallthrough
CT: control target
= control target key end

     0   :  { %vm753_vm0 = vcmask 1043456   ;;  %vm2633_vm1 = vmmov 0   ;;  %vm749_vm2 = vcmask 31744   ;;  %vm837_vm3 = vcmask 261120   ;;  %s2636_s29 = smov 124   ;;  %s3392_s1 = inlined_call_operand.vmem [shape: bf16[256,512], index: 1, kind: input, shape index: {}]   ;;  %s3393_s0 = inlined_call_operand.vmem [shape: f32[8,256], index: 0, kind: input, shape index: {}]   ;;  %s3394_s3 = inlined_call_operand.vmem [shape: f32[512,16], index: 3, kind: input, shape index: {}]   ;;  %s3395_s2 = inlined_call_operand.vmem [shape: f32[1,512], index: 2, kind: input, shape index: {}]   ;;  %s3396_s5 = inlined_call_operand.vmem [shape: f32[2,176,32], index: 5, kind: input, shape index: {}]   ;;  %s3397_s4 = inlined_call_operand.vmem [shape: f32[1,16], index: 4, kind: input, shape index: {}]   ;;  %s3398_s6 = inlined_call_operand.vmem [shape: f32[8,64], index: 6, kind: input, shape index: {}]   ;;  %s3399_s8 = inlined_call_operand.vmem [shape: bf16[64,256], index: 8, kind: input, shape index: {}]   ;;  %s3400_s10 = inlined_call_operand.vmem [shape: f32[8,384], index: 10, kind: output, shape index: {}]   ;;  %s3401_s7 = inlined_call_operand.vmem [shape: f32[1,64], index: 7, kind: input, shape index: {}]   ;;  %s3402_s9 = inlined_call_operand.vmem [shape: f32[1,256], index: 9, kind: input, shape index: {}]  }
   0x1   :  { %v2512_v0 = vld [vmem:[%s3392_s1 + $0x4] ss:$16 sps:$4 sm:$0xff]   ;;  %v2514_v1 = vld [vmem:[%s3392_s1 + $0xc] ss:$16 sps:$4 sm:$0xff]   ;;  %v2516_v2 = vld [vmem:[%s3392_s1] ss:$16 sps:$4 sm:$0xff]  }
   0x2   :  { %446 = vmatprep.subr.bf16.mxu0 %v2512_v0  ;;  %v2517_v3 = vld [vmem:[%s3392_s1 + $0x8] ss:$16 sps:$4 sm:$0xff]   ;;  %487 = vmatprep.subr.bf16.mxu1 %v2514_v1  ;;  %v2518_v4 = vld [vmem:[%s3392_s1 + $0x24] ss:$16 sps:$4 sm:$0xff]   ;;  %v2520_v5 = vld [vmem:[%s3392_s1 + $0x2c] ss:$16 sps:$4 sm:$0xff]  }
   0x3   :  { %447 = vmatpush1.bf16.msra.mxu0 %v2516_v2  ;;  %488 = vmatpush1.bf16.msra.mxu1 %v2517_v3  ;;  %v2522_v6 = vld [vmem:[%s3392_s1 + $0x20] ss:$16 sps:$4 sm:$0xff]   ;;  %v2523_v7 = vld [vmem:[%s3392_s1 + $0x28] ss:$16 sps:$4 sm:$0xff]   ;;  %v2524_v8 = vld [vmem:[%s3392_s1 + $0x44] ss:$16 sps:$4 sm:$0xff]  }
   0x4   :  { %448 = vmatprep.subr.bf16.mxu0 %v2518_v4  ;;  %489 = vmatprep.subr.bf16.mxu1 %v2520_v5  ;;  %v2526_v9 = vld [vmem:[%s3392_s1 + $0x4c] ss:$16 sps:$4 sm:$0xff]   ;;  %v2528_v10 = vld [vmem:[%s3392_s1 + $0x40] ss:$16 sps:$4 sm:$0xff]   ;;  %v2529_v11 = vld [vmem:[%s3392_s1 + $0x48] ss:$16 sps:$4 sm:$0xff]  }
   0x5   :  { %v2530_v12 = vld [vmem:[%s3392_s1 + $0x64] ss:$16 sps:$4 sm:$0xff]   ;;  %v2532_v13 = vld [vmem:[%s3392_s1 + $0x6c] ss:$16 sps:$4 sm:$0xff]   ;;  %v2534_v14 = vld [vmem:[%s3392_s1 + $0x60] ss:$16 sps:$4 sm:$0xff]  }
   0x6   :  { %v2535_v15 = vld [vmem:[%s3392_s1 + $0x68] ss:$16 sps:$4 sm:$0xff]   ;;  %v2536_v16 = vld [vmem:[%s3392_s1 + $0x84] ss:$16 sps:$4 sm:$0xff]   ;;  %v2538_v17 = vld [vmem:[%s3392_s1 + $0x8c] ss:$16 sps:$4 sm:$0xff]  }
   0x7   :  { %449 = vmatpush1.bf16.msra.mxu0 %v2522_v6  ;;  %490 = vmatpush1.bf16.msra.mxu1 %v2523_v7  ;;  %v2540_v18 = vld [vmem:[%s3392_s1 + $0x80] ss:$16 sps:$4 sm:$0xff]   ;;  %v2541_v19 = vld [vmem:[%s3392_s1 + $0x88] ss:$16 sps:$4 sm:$0xff]   ;;  %v2542_v20 = vld [vmem:[%s3392_s1 + $0xa4] ss:$16 sps:$4 sm:$0xff]  }
   0x8   :  { %450 = vmatprep.subr.bf16.mxu0 %v2524_v8  ;;  %491 = vmatprep.subr.bf16.mxu1 %v2526_v9  ;;  %v2544_v21 = vld [vmem:[%s3392_s1 + $0xac] ss:$16 sps:$4 sm:$0xff]   ;;  %v2546_v22 = vld [vmem:[%s3392_s1 + $0xa0] ss:$16 sps:$4 sm:$0xff]   ;;  %v2547_v23 = vld [vmem:[%s3392_s1 + $0xa8] ss:$16 sps:$4 sm:$0xff]  }
   0x9   :  { %v2548_v24 = vld [vmem:[%s3392_s1 + $0xc4] ss:$16 sps:$4 sm:$0xff]   ;;  %v2550_v25 = vld [vmem:[%s3392_s1 + $0xcc] ss:$16 sps:$4 sm:$0xff]   ;;  %v2552_v26 = vld [vmem:[%s3392_s1 + $0xc0] ss:$16 sps:$4 sm:$0xff]  }
   0xa   :  { %v2553_v27 = vld [vmem:[%s3392_s1 + $0xc8] ss:$16 sps:$4 sm:$0xff]   ;;  %v2554_v28 = vld [vmem:[%s3392_s1 + $0xe4] ss:$16 sps:$4 sm:$0xff]   ;;  %v2556_v29 = vld [vmem:[%s3392_s1 + $0xec] ss:$16 sps:$4 sm:$0xff]  }
   0xb   :  { %451 = vmatpush1.bf16.msra.mxu0 %v2528_v10  ;;  %492 = vmatpush1.bf16.msra.mxu1 %v2529_v11  ;;  %v2558_v30 = vld [vmem:[%s3392_s1 + $0xe0] ss:$16 sps:$4 sm:$0xff]   ;;  %v2559_v31 = vld [vmem:[%s3392_s1 + $0xe8] ss:$16 sps:$4 sm:$0xff]   ;;  %v2560_v32 = vld [vmem:[%s3392_s1 + $0x104] ss:$16 sps:$4 sm:$0xff]  }
   0xc   :  { %452 = vmatprep.subr.bf16.mxu0 %v2530_v12  ;;  %493 = vmatprep.subr.bf16.mxu1 %v2532_v13  ;;  %v2562_v33 = vld [vmem:[%s3392_s1 + $0x10c] ss:$16 sps:$4 sm:$0xff]   ;;  %v2564_v34 = vld [vmem:[%s3392_s1 + $0x100] ss:$16 sps:$4 sm:$0xff]   ;;  %v2565_v35 = vld [vmem:[%s3392_s1 + $0x108] ss:$16 sps:$4 sm:$0xff]  }
   0xd   :  { %v2566_v36 = vld [vmem:[%s3392_s1 + $0x124] ss:$16 sps:$4 sm:$0xff]   ;;  %v2568_v37 = vld [vmem:[%s3392_s1 + $0x12c] ss:$16 sps:$4 sm:$0xff]   ;;  %v2570_v38 = vld [vmem:[%s3392_s1 + $0x120] ss:$16 sps:$4 sm:$0xff]  }
   0xe   :  { %v2571_v39 = vld [vmem:[%s3392_s1 + $0x128] ss:$16 sps:$4 sm:$0xff]   ;;  %v2572_v40 = vld [vmem:[%s3392_s1 + $0x144] ss:$16 sps:$4 sm:$0xff]   ;;  %v2574_v41 = vld [vmem:[%s3392_s1 + $0x14c] ss:$16 sps:$4 sm:$0xff]  }
   0xf   :  { %453 = vmatpush1.bf16.msra.mxu0 %v2534_v14  ;;  %494 = vmatpush1.bf16.msra.mxu1 %v2535_v15  ;;  %v2576_v42 = vld [vmem:[%s3392_s1 + $0x140] ss:$16 sps:$4 sm:$0xff]   ;;  %v2577_v43 = vld [vmem:[%s3392_s1 + $0x148] ss:$16 sps:$4 sm:$0xff]   ;;  %v2578_v44 = vld [vmem:[%s3392_s1 + $0x164] ss:$16 sps:$4 sm:$0xff]  }
  0x10   :  { %454 = vmatprep.subr.bf16.mxu0 %v2536_v16  ;;  %495 = vmatprep.subr.bf16.mxu1 %v2538_v17  ;;  %v2580_v45 = vld [vmem:[%s3392_s1 + $0x16c] ss:$16 sps:$4 sm:$0xff]   ;;  %v2582_v47 = vld [vmem:[%s3392_s1 + $0x160] ss:$16 sps:$4 sm:$0xff]   ;;  %v2583_v48 = vld [vmem:[%s3392_s1 + $0x168] ss:$16 sps:$4 sm:$0xff]  }
  0x11   :  { %v37_v46 = vld [vmem:[%s3393_s0 + $0x8] sm:$0xff]  ;;  %v2584_v50 = vld [vmem:[%s3392_s1 + $0x184] ss:$16 sps:$4 sm:$0xff]   ;;  %v2588_v52 = vld [vmem:[%s3392_s1 + $0x180] ss:$16 sps:$4 sm:$0xff]   ;;  %vm1802_vm4 = vcmask 64512  }
  0x12   :  { %v39_v49 = vpack.c.bf16 %v37_v46, %v37_v46  ;;  %v2586_v51 = vld [vmem:[%s3392_s1 + $0x18c] ss:$16 sps:$4 sm:$0xff]   ;;  %v2589_v53 = vld [vmem:[%s3392_s1 + $0x188] ss:$16 sps:$4 sm:$0xff]   ;;  %v2590_v54 = vld [vmem:[%s3392_s1 + $0x1a4] ss:$16 sps:$4 sm:$0xff]  }
  0x13   :  { %455 = vmatpush1.bf16.msra.mxu0 %v2540_v18  ;;  %496 = vmatpush1.bf16.msra.mxu1 %v2541_v19  ;;  %v2592_v55 = vld [vmem:[%s3392_s1 + $0x1ac] ss:$16 sps:$4 sm:$0xff]   ;;  %v2594_v56 = vld [vmem:[%s3392_s1 + $0x1a0] ss:$16 sps:$4 sm:$0xff]   ;;  %v2595_v57 = vld [vmem:[%s3392_s1 + $0x1a8] ss:$16 sps:$4 sm:$0xff]  }
  0x14   :  { %456 = vmatprep.subr.bf16.mxu0 %v2542_v20  ;;  %497 = vmatprep.subr.bf16.mxu1 %v2544_v21  ;;  %v2596_v58 = vld [vmem:[%s3392_s1 + $0x1c4] ss:$16 sps:$4 sm:$0xff]   ;;  %v2598_v59 = vld [vmem:[%s3392_s1 + $0x1cc] ss:$16 sps:$4 sm:$0xff]   ;;  %v2600_v60 = vld [vmem:[%s3392_s1 + $0x1c0] ss:$16 sps:$4 sm:$0xff]  }
  0x15   :  { %478 = vmatprep.mubr.bf16.mxu0 %v39_v49  ;;  %519 = vmatprep.mubr.bf16.mxu1 %v39_v49  ;;  %v2601_v61 = vld [vmem:[%s3392_s1 + $0x1c8] ss:$16 sps:$4 sm:$0xff]   ;;  %v2602_v62 = vld [vmem:[%s3392_s1 + $0x1e4] ss:$16 sps:$4 sm:$0xff]   ;;  %v2604_v63 = vld [vmem:[%s3392_s1 + $0x1ec] ss:$16 sps:$4 sm:$0xff]  }
  0x16   :  { %v548_v0 = vld [vmem:[%s3394_s3 + $0x80] sm:$0xff]  ;;  %v549_v1 = vld [vmem:[%s3394_s3 + $0x88] sm:$0xff]  ;;  %v550_v13 = vld [vmem:[%s3394_s3 + $0x90] sm:$0xff]  ;;  %vm1986_vm5 = vcmask 130048   ;;  %vm1988_vm6 = vcmask 195584   ;;  %vm1990_vm7 = vcmask 203776  }
  0x17   :  { %457 = vmatpush1.bf16.msra.mxu0 %v2546_v22  ;;  %498 = vmatpush1.bf16.msra.mxu1 %v2547_v23  ;;  %v580_v2 = vld [vmem:[%s3394_s3 + $0x180] sm:$0xff]  ;;  %v581_v3 = vld [vmem:[%s3394_s3 + $0x188] sm:$0xff]  ;;  %v2381_v9 = vpack.c.bf16 %v549_v1, %v548_v0  ;;  %v551_v14 = vld [vmem:[%s3394_s3 + $0x98] sm:$0xff]  ;;  %vm1938_vm8 = vcmask 523264  }
  0x18   :  { %458 = vmatprep.subr.bf16.mxu0 %v2548_v24  ;;  %499 = vmatprep.subr.bf16.mxu1 %v2550_v25  ;;  %v2606_v4 = vld [vmem:[%s3392_s1 + $0x1e0] ss:$16 sps:$4 sm:$0xff]   ;;  %v2607_v5 = vld [vmem:[%s3392_s1 + $0x1e8] ss:$16 sps:$4 sm:$0xff]   ;;  %v2413_v10 = vpack.c.bf16 %v581_v3, %v580_v2  ;;  %v2385_v22 = vpack.c.bf16 %v551_v14, %v550_v13 }
  0x19   :  { %v36_v6 = vld [vmem:[%s3393_s0] sm:$0xff]  ;;  %v533_v8 = vld [vmem:[%s3394_s3 + $0x8] sm:$0xff]  ;;  %v582_v15 = vld [vmem:[%s3394_s3 + $0x190] sm:$0xff] }
  0x1a   :  { %v532_v7 = vld [vmem:[%s3394_s3] sm:$0xff]  ;;  %v565_v12 = vld [vmem:[%s3394_s3 + $0x108] sm:$0xff]  ;;  %v583_v16 = vld [vmem:[%s3394_s3 + $0x198] sm:$0xff]  ;;  %v38_v17 = vpack.c.bf16 %v36_v6, %v36_v6 }
  0x1b   :  { %459 = vmatpush1.bf16.msra.mxu0 %v2552_v26  ;;  %500 = vmatpush1.bf16.msra.mxu1 %v2553_v27  ;;  %v564_v11 = vld [vmem:[%s3394_s3 + $0x100] sm:$0xff]  ;;  %v2383_v18 = vpack.c.bf16 %v533_v8, %v532_v7  ;;  %v534_v20 = vld [vmem:[%s3394_s3 + $0x10] sm:$0xff]  ;;  %v535_v21 = vld [vmem:[%s3394_s3 + $0x18] sm:$0xff]  ;;  %v2417_v23 = vpack.c.bf16 %v583_v16, %v582_v15 }
  0x1c   :  { %460 = vmatprep.subr.bf16.mxu0 %v2554_v28  ;;  %501 = vmatprep.subr.bf16.mxu1 %v2556_v29  ;;  %v2415_v19 = vpack.c.bf16 %v565_v12, %v564_v11  ;;  %v566_v24 = vld [vmem:[%s3394_s3 + $0x110] sm:$0xff]  ;;  %v567_v25 = vld [vmem:[%s3394_s3 + $0x118] sm:$0xff]  ;;  %v552_v26 = vld [vmem:[%s3394_s3 + $0xa0] sm:$0xff] }
  0x1d   :  { %v553_v27 = vld [vmem:[%s3394_s3 + $0xa8] sm:$0xff]  ;;  %v584_v28 = vld [vmem:[%s3394_s3 + $0x1a0] sm:$0xff]  ;;  %v571_v49 = vld [vmem:[%s3394_s3 + $0x138] sm:$0xff] }
  0x1e   :  { %v585_v29 = vld [vmem:[%s3394_s3 + $0x1a8] sm:$0xff]  ;;  %v590_v0 = vld [vmem:[%s3394_s3 + $0x1d0] sm:$0xff]  ;;  %v591_v1 = vld [vmem:[%s3394_s3 + $0x1d8] sm:$0xff] }
  0x1f   :  { %461 = vmatpush1.bf16.msra.mxu0 %v2558_v30  ;;  %502 = vmatpush1.bf16.msra.mxu1 %v2559_v31  ;;  %v2387_v30 = vpack.c.bf16 %v535_v21, %v534_v20  ;;  %v2419_v31 = vpack.c.bf16 %v567_v25, %v566_v24  ;;  %v2433_v7 = vpack.c.bf16 %v591_v1, %v590_v0  ;;  %v574_v8 = vld [vmem:[%s3394_s3 + $0x150] sm:$0xff]  ;;  %v561_v11 = vld [vmem:[%s3394_s3 + $0xe8] sm:$0xff]  ;;  %v592_v12 = vld [vmem:[%s3394_s3 + $0x1e0] sm:$0xff]  ;;  %v2634_v1 = vmov 0.0|0.0  }
  0x20   :  { %462 = vmatprep.subr.bf16.mxu0 %v2560_v32  ;;  %503 = vmatprep.subr.bf16.mxu1 %v2562_v33  ;;  %v536_v32 = vld [vmem:[%s3394_s3 + $0x20] sm:$0xff]  ;;  %v537_v33 = vld [vmem:[%s3394_s3 + $0x28] sm:$0xff]  ;;  %v562_v24 = vld [vmem:[%s3394_s3 + $0xf0] sm:$0xff] }
  0x21   :  { %v593_v13 = vld [vmem:[%s3394_s3 + $0x1e8] sm:$0xff]  ;;  %v576_v20 = vld [vmem:[%s3394_s3 + $0x160] sm:$0xff]  ;;  %v563_v25 = vld [vmem:[%s3394_s3 + $0xf8] sm:$0xff] }
  0x22   :  { %v743_v0 = vld [vmem:[%s3396_s5] sm:$0xf] }
  0x23   :  { %463 = vmatpush1.bf16.msra.mxu0 %v2564_v34  ;;  %504 = vmatpush1.bf16.msra.mxu1 %v2565_v35  ;;  %v2389_v34 = vpack.c.bf16 %v553_v27, %v552_v26  ;;  %v2421_v35 = vpack.c.bf16 %v585_v29, %v584_v28  ;;  %v594_v26 = vld [vmem:[%s3394_s3 + $0x1f0] sm:$0xff]  ;;  %v2409_v27 = vpack.c.bf16 %v563_v25, %v562_v24  ;;  %v595_v28 = vld [vmem:[%s3394_s3 + $0x1f8] sm:$0xff] }
  0x24   :  { %464 = vmatprep.subr.bf16.mxu0 %v2566_v36  ;;  %505 = vmatprep.subr.bf16.mxu1 %v2568_v37  ;;  %v568_v36 = vld [vmem:[%s3394_s3 + $0x120] sm:$0xff]  ;;  %v569_v37 = vld [vmem:[%s3394_s3 + $0x128] sm:$0xff]  ;;  %v546_v29 = vld [vmem:[%s3394_s3 + $0x70] sm:$0xff] }
  0x25   :  { %v914_v25 = vld [vmem:[%s3396_s5 + $0x38] sm:$0xff] }
  0x27   :  { %465 = vmatpush1.bf16.msra.mxu0 %v2570_v38  ;;  %506 = vmatpush1.bf16.msra.mxu1 %v2571_v39  ;;  %v554_v38 = vld [vmem:[%s3394_s3 + $0xb0] sm:$0xff]  ;;  %v555_v39 = vld [vmem:[%s3394_s3 + $0xb8] sm:$0xff] }
  0x28   :  { %466 = vmatprep.subr.bf16.mxu0 %v2572_v40  ;;  %507 = vmatprep.subr.bf16.mxu1 %v2574_v41  ;;  %v586_v40 = vld [vmem:[%s3394_s3 + $0x1b0] sm:$0xff]  ;;  %v587_v41 = vld [vmem:[%s3394_s3 + $0x1b8] sm:$0xff]  ;;  %v2393_v46 = vpack.c.bf16 %v555_v39, %v554_v38 }
  0x2b   :  { %467 = vmatpush1.bf16.msra.mxu0 %v2576_v42  ;;  %508 = vmatpush1.bf16.msra.mxu1 %v2577_v43  ;;  %v2391_v42 = vpack.c.bf16 %v537_v33, %v536_v32  ;;  %v2423_v43 = vpack.c.bf16 %v569_v37, %v568_v36  ;;  %v578_v33 = vld [vmem:[%s3394_s3 + $0x170] sm:$0xff]  ;;  %v106_v36 = vlaneseq }
  0x2c   :  { %468 = vmatprep.subr.bf16.mxu0 %v2578_v44  ;;  %509 = vmatprep.subr.bf16.mxu1 %v2580_v45  ;;  %v538_v44 = vld [vmem:[%s3394_s3 + $0x30] sm:$0xff]  ;;  %v539_v45 = vld [vmem:[%s3394_s3 + $0x38] sm:$0xff] }
  0x2d   :  { %v3084_v37 = vshrl.u32 %v106_v36, 7  ;;  %v998_v36 = vld [vmem:[%s3396_s5 + $0x58] sm:$0xff] }
  0x2f   :  { %469 = vmatpush1.bf16.msra.mxu0 %v2582_v47  ;;  %510 = vmatpush1.bf16.msra.mxu1 %v2583_v48  ;;  %v2425_v47 = vpack.c.bf16 %v587_v41, %v586_v40  ;;  %v570_v48 = vld [vmem:[%s3394_s3 + $0x130] sm:$0xff]  ;;  %v108_v38 = vsub.s32 0, %v3084_v37  ;;  %v116_v39 = vsub.s32 2, %v3084_v37  ;;  %v104_v40 = vld [vmem:[%s3395_s2] sm:$0xf]  ;;  %v112_v41 = vsub.s32 1, %v3084_v37 }
  0x30   :  { %470 = vmatprep.subr.bf16.mxu0 %v2584_v50  ;;  %511 = vmatprep.subr.bf16.mxu1 %v2586_v51  ;;  %v556_v50 = vld [vmem:[%s3394_s3 + $0xc0] sm:$0xff]  ;;  %v557_v51 = vld [vmem:[%s3394_s3 + $0xc8] sm:$0xff] }
  0x33   :  { %471 = vmatpush1.bf16.msra.mxu0 %v2588_v52  ;;  %512 = vmatpush1.bf16.msra.mxu1 %v2589_v53  ;;  %v588_v52 = vld [vmem:[%s3394_s3 + $0x1c0] sm:$0xff]  ;;  %v589_v53 = vld [vmem:[%s3394_s3 + $0x1c8] sm:$0xff] }
  0x34   :  { %472 = vmatprep.subr.bf16.mxu0 %v2590_v54  ;;  %513 = vmatprep.subr.bf16.mxu1 %v2592_v55  ;;  %v2395_v54 = vpack.c.bf16 %v539_v45, %v538_v44  ;;  %v2427_v55 = vpack.c.bf16 %v571_v49, %v570_v48  ;;  %v117_v44 = vrot.slane %v104_v40, %v116_v39  ;;  %v999_v39 = vld [vmem:[%s3396_s5 + $0x60] sm:$0xff] }
  0x35   :  { %v113_v45 = vrot.slane %v104_v40, %v112_v41 }
  0x37   :  { %473 = vmatpush1.bf16.msra.mxu0 %v2594_v56  ;;  %514 = vmatpush1.bf16.msra.mxu1 %v2595_v57  ;;  %v540_v56 = vld [vmem:[%s3394_s3 + $0x40] sm:$0xff]  ;;  %v541_v57 = vld [vmem:[%s3394_s3 + $0x48] sm:$0xff] }
  0x38   :  { %474 = vmatprep.subr.bf16.mxu0 %v2596_v58  ;;  %515 = vmatprep.subr.bf16.mxu1 %v2598_v59  ;;  %v2397_v58 = vpack.c.bf16 %v557_v51, %v556_v50  ;;  %v2429_v59 = vpack.c.bf16 %v589_v53, %v588_v52  ;;  %v2399_v2 = vpack.c.bf16 %v541_v57, %v540_v56 }
  0x3b   :  { %475 = vmatpush1.bf16.msra.mxu0 %v2600_v60  ;;  %516 = vmatpush1.bf16.msra.mxu1 %v2601_v61  ;;  %v572_v60 = vld [vmem:[%s3394_s3 + $0x140] sm:$0xff]  ;;  %v573_v61 = vld [vmem:[%s3394_s3 + $0x148] sm:$0xff] }
  0x3c   :  { %476 = vmatprep.subr.bf16.mxu0 %v2602_v62  ;;  %517 = vmatprep.subr.bf16.mxu1 %v2604_v63  ;;  %v558_v62 = vld [vmem:[%s3394_s3 + $0xd0] sm:$0xff]  ;;  %v559_v63 = vld [vmem:[%s3394_s3 + $0xd8] sm:$0xff]  ;;  %v2431_v3 = vpack.c.bf16 %v573_v61, %v572_v60 }
  0x3d   :  { %v2401_v6 = vpack.c.bf16 %v559_v63, %v558_v62  ;;  %v2632_v63 = vmov 0.0  }
  0x3f   :  { %477 = vmatpush1.bf16.msra.mxu0 %v2606_v4  ;;  %518 = vmatpush1.bf16.msra.mxu1 %v2607_v5  ;;  %v542_v4 = vld [vmem:[%s3394_s3 + $0x50] sm:$0xff]  ;;  %v543_v5 = vld [vmem:[%s3394_s3 + $0x58] sm:$0xff] }
  0x40   :  { %2382 = vmatprep.subr.bf16.mxu0 %v2381_v9  ;;  %2414 = vmatprep.subr.bf16.mxu1 %v2413_v10  ;;  %v575_v9 = vld [vmem:[%s3394_s3 + $0x158] sm:$0xff]  ;;  %v560_v10 = vld [vmem:[%s3394_s3 + $0xe0] sm:$0xff]  ;;  %v2403_v14 = vpack.c.bf16 %v543_v5, %v542_v4 }
  0x41   :  { %v2435_v15 = vpack.c.bf16 %v575_v9, %v574_v8  ;;  %v2405_v16 = vpack.c.bf16 %v561_v11, %v560_v10  ;;  %v2063_v4 = vld [vmem:[%s3397_s4] ss:$0 sm:$0xff]  ;;  %v828_v9 = vld [vmem:[%s3396_s5 + $0x8] sm:$0xff]  ;;  %v829_v10 = vld [vmem:[%s3396_s5 + $0x10] sm:$0xff]  ;;  %s2635_s4 = smov 4  }
  0x42   :  { %479 = vmatmul.mubr.bf16.vlgmr.msra.gmra.mrb[0].mxu0 %v38_v17  ;;  %520 = vmatmul.mubr.bf16.vlgmr.msra.gmra.mrb[0].mxu1 %v38_v17  ;;  %v2437_v17 = vpack.c.bf16 %v593_v13, %v592_v12  ;;  %v2446_v12 = vpack.c.bf16 %v829_v10, %v828_v9  ;;  %v2075_v9 = vld [vmem:[%s3396_s5 + $0xad] ss:$0 sm:$0xff] }
  0x43   :  { %2384 = vmatpush3.bf16.msra.mxu0 %v2383_v18  ;;  %2416 = vmatpush3.bf16.msra.mxu1 %v2415_v19  ;;  %v544_v18 = vld [vmem:[%s3394_s3 + $0x60] sm:$0xff]  ;;  %v545_v19 = vld [vmem:[%s3394_s3 + $0x68] sm:$0xff] }
  0x44   :  { %2386 = vmatprep.subr.bf16.mxu0 %v2385_v22  ;;  %2418 = vmatprep.subr.bf16.mxu1 %v2417_v23  ;;  %v2407_v21 = vpack.c.bf16 %v545_v19, %v544_v18  ;;  %v577_v22 = vld [vmem:[%s3394_s3 + $0x168] sm:$0xff]  ;;  %v913_v19 = vld [vmem:[%s3396_s5 + $0x30] sm:$0xff] }
  0x45   :  { %v2439_v23 = vpack.c.bf16 %v577_v22, %v576_v20  ;;  %v912_v18 = vld [vmem:[%s3396_s5 + $0x28] sm:$0xff] }
  0x47   :  { %2388 = vmatpush3.bf16.msra.mxu0 %v2387_v30  ;;  %2420 = vmatpush3.bf16.msra.mxu1 %v2419_v31  ;;  %v547_v30 = vld [vmem:[%s3394_s3 + $0x78] sm:$0xff]  ;;  %v2441_v31 = vpack.c.bf16 %v595_v28, %v594_v26  ;;  %v915_v26 = vld [vmem:[%s3396_s5 + $0x40] sm:$0xff]  ;;  %v2067_v28 = vld [vmem:[%s3396_s5 + $0xa9] ss:$0 sm:$0xff] }
  0x48   :  { %2390 = vmatprep.subr.bf16.mxu0 %v2389_v34  ;;  %2422 = vmatprep.subr.bf16.mxu1 %v2421_v35  ;;  %v2411_v32 = vpack.c.bf16 %v547_v30, %v546_v29  ;;  %v579_v34 = vld [vmem:[%s3394_s3 + $0x178] sm:$0xff] }
  0x49   :  { %v2443_v35 = vpack.c.bf16 %v579_v34, %v578_v33  ;;  %v996_v33 = vld [vmem:[%s3396_s5 + $0x48] sm:$0xff]  ;;  %v997_v34 = vld [vmem:[%s3396_s5 + $0x50] sm:$0xff] }
  0x4b   :  { %2392 = vmatpush3.bf16.msra.mxu0 %v2391_v42  ;;  %2424 = vmatpush3.bf16.msra.mxu1 %v2423_v43  ;;  %v120_v42 = vsub.s32 3, %v3084_v37  ;;  %v109_v43 = vrot.slane %v104_v40, %v108_v38 }
  0x4c   :  { %2394 = vmatprep.subr.bf16.mxu0 %v2393_v46  ;;  %2426 = vmatprep.subr.bf16.mxu1 %v2425_v47 }
  0x4d   :  { %v121_v46 = vrot.slane %v104_v40, %v120_v42  ;;  %v2461_v40 = vpack.c.bf16 %v999_v39, %v998_v36  ;;  %v1079_v42 = vld [vmem:[%s3396_s5 + $0x68] sm:$0xff] }
  0x4f   :  { %2396 = vmatpush3.bf16.msra.mxu0 %v2395_v54  ;;  %2428 = vmatpush3.bf16.msra.mxu1 %v2427_v55 }
  0x50   :  { %2398 = vmatprep.subr.bf16.mxu0 %v2397_v58  ;;  %2430 = vmatprep.subr.bf16.mxu1 %v2429_v59 }
  0x53   :  { %2400 = vmatpush3.bf16.msra.mxu0 %v2399_v2  ;;  %2432 = vmatpush3.bf16.msra.mxu1 %v2431_v3 }
  0x54   :  { %2402 = vmatprep.subr.bf16.mxu0 %v2401_v6  ;;  %2434 = vmatprep.subr.bf16.mxu1 %v2433_v7 }
  0x57   :  { %2404 = vmatpush3.bf16.msra.mxu0 %v2403_v14  ;;  %2436 = vmatpush3.bf16.msra.mxu1 %v2435_v15  ;;  %v830_v14 = vld [vmem:[%s3396_s5 + $0x18] sm:$0xff]  ;;  %v831_v15 = vld [vmem:[%s3396_s5 + $0x20] sm:$0xff] }
  0x58   :  { %2406 = vmatprep.subr.bf16.mxu0 %v2405_v16  ;;  %2438 = vmatprep.subr.bf16.mxu1 %v2437_v17  ;;  %v2449_v16 = vpack.c.bf16 %v831_v15, %v830_v14  ;;  %v2064_v17 = vld [vmem:[%s3396_s5 + $0xa8] ss:$0 sm:$0xff] }
  0x5b   :  { %2408 = vmatpush3.bf16.msra.mxu0 %v2407_v21  ;;  %2440 = vmatpush3.bf16.msra.mxu1 %v2439_v23  ;;  %v2452_v23 = vpack.c.bf16 %v913_v19, %v912_v18 }
  0x5c   :  { %2410 = vmatprep.subr.bf16.mxu0 %v2409_v27  ;;  %2442 = vmatprep.subr.bf16.mxu1 %v2441_v31  ;;  %v2455_v27 = vpack.c.bf16 %v915_v26, %v914_v25 }
  0x5f   :  { %2412 = vmatpush3.bf16.msra.mxu0 %v2411_v32  ;;  %2444 = vmatpush3.bf16.msra.mxu1 %v2443_v35  ;;  %v2458_v35 = vpack.c.bf16 %v997_v34, %v996_v33  ;;  %v2080_v33 = vld [vmem:[%s3396_s5 + $0x158] ss:$0 sm:$0xff] }
  0x60   :  { %2256 = vmatprep.subr.mxu0 %v2632_v63  ;;  %2457 = vmatprep.subr.bf16.mxu1 %v2634_v1 }
 0x115   :  { %v480_v47 = vpop.f32.mrb[0].mxu0  ;;  %v521_v48 = vpop.f32.mrb[0].mxu1 }
 0x116   :  { %v481_v49 = vadd.f32 %v480_v47, %v109_v43  ;;  %v522_v50 = vadd.f32 %v521_v48, %v117_v44  ;;  %v482_v51 = vpop.f32.mrb[1].mxu0  ;;  %v523_v52 = vpop.f32.mrb[1].mxu1  ;;  %v1080_v43 = vld [vmem:[%s3396_s5 + $0x70] sm:$0xff] }
 0x117   :  { %v483_v53 = vadd.f32 %v482_v51, %v113_v45  ;;  %v524_v54 = vadd.f32 %v523_v52, %v121_v46  ;;  %v484_v55 = vpop.f32.mrb[2].mxu0  ;;  %v525_v56 = vpop.f32.mrb[2].mxu1  ;;  %v2464_v44 = vpack.c.bf16 %v1080_v43, %v1079_v42  ;;  %v2069_v45 = vld [vmem:[%s3396_s5 + $0xaa] ss:$0 sm:$0xff]  ;;  %v1081_v51 = vld [vmem:[%s3396_s5 + $0x78] sm:$0xff]  ;;  %v1082_v52 = vld [vmem:[%s3396_s5 + $0x80] sm:$0xff] }
 0x118   :  { %v530_v57 = vmax.f32 %v522_v50, 0.0  ;;  %v485_v58 = vpop.f32.mrb[3].mxu0  ;;  %v526_v59 = vpop.f32.mrb[3].mxu1  ;;  %v528_v62 = vmax.f32 %v481_v49, 0.0  ;;  %v1163_v55 = vld [vmem:[%s3396_s5 + $0x90] sm:$0xff] }
 0x119   :  { %v529_v60 = vmax.f32 %v483_v53, 0.0  ;;  %v531_v61 = vmax.f32 %v524_v54, 0.0  ;;  %v2467_v53 = vpack.c.bf16 %v1082_v52, %v1081_v51  ;;  %v1162_v54 = vld [vmem:[%s3396_s5 + $0x88] sm:$0xff]  ;;  %v2093_v42 = vld [vmem:[%s3396_s5 + $0xf0] sm:$0xff] }
 0x11a   :  { %v2470_v56 = vpack.c.bf16 %v1163_v55, %v1162_v54  ;;  %v2099_v52 = vld [vmem:[%s3396_s5 + $0x108] sm:$0xff]  ;;  %v2104_v55 = vld [vmem:[%s3396_s5 + $0x118] sm:$0xff] }
 0x11b   :  { %667 = vmatprep.mubr.f32.mxu0 %v529_v60  ;;  %737 = vmatprep.mubr.f32.mxu1 %v531_v61 }
 0x11c   :  { %668 = vmatmul.mubr.f32.vlgmr.msra.gmra.mrb[4].mxu0 %v528_v62  ;;  %738 = vmatmul.mubr.f32.vlgmr.msra.gmra.mrb[4].mxu1 %v530_v57  ;;  %v2071_v57 = vld [vmem:[%s3396_s5 + $0xab] ss:$0 sm:$0xff]  ;;  %v1164_v62 = vld [vmem:[%s3396_s5 + $0x98] sm:$0xff] }
 0x11d   :  { %2257 = vmatpush3.msk.msra.mxu0 %vm753_vm0, %v743_v0  ;;  %2258 = vmatprep.mubr.msk.f32.mxu0 %vm2633_vm1, %v2632_v63  ;;  %v1165_v0 = vld [vmem:[%s3396_s5 + $0xa0] sm:$0xff] }
 0x11e   :  { %2291 = vmatprep.mubr.msk.f32.mxu1 %vm2633_vm1, %v2632_v63  ;;  %2445 = vmatprep.subr.bf16.mxu0 %v2634_v1 }
 0x11f   :  { %2459 = vmatpush3.bf16.msra.mxu1 %v2458_v35 }
 0x120   :  { %2460 = vmatprep.subr.bf16.mxu1 %v2634_v1 }
 0x123   :  { %2462 = vmatpush3.bf16.msra.mxu1 %v2461_v40  ;;  %v2092_v40 = vld [vmem:[%s3396_s5 + $0xe8] sm:$0xff] }
 0x124   :  { %2469 = vmatprep.subr.bf16.mxu1 %v2634_v1  ;;  %v2485_v43 = vpack.c.bf16 %v2093_v42, %v2092_v40 }
 0x1ef   :  { %v2162_v2 = vpop.f32.mrb[4].mxu0  ;;  %v2197_v3 = vpop.f32.mrb[4].mxu1 }
 0x1f0   :  { %v2163_v5 = vpop.f32.mrb[5].mxu0  ;;  %v2198_v6 = vpop.f32.mrb[5].mxu1 }
 0x1f1   :  { %v2164_v7 = vadd.f32 %v2163_v5, %v2162_v2  ;;  %v2199_v8 = vadd.f32 %v2198_v6, %v2197_v3  ;;  %v2473_v2 = vpack.c.bf16 %v1165_v0, %v1164_v62  ;;  %v2073_v3 = vld [vmem:[%s3396_s5 + $0xac] ss:$0 sm:$0xff] }
 0x1f3   :  { %v670_v11 = vadd.f32 %v2164_v7, %v2063_v4 }
 0x1f5   :  { %v3117_v13 = vadd.f32 %v2199_v8, %v670_v11  ;;  %v2078_v8 = vld [vmem:[%s3396_s5 + $0xb0] sm:$0xf] }
 0x1f7   :  { %2259 = vmatmul.mubr.msk.f32.vlgmr.msra.gmra.mrb[6].mxu0 %vm749_vm2, %v3117_v13 }
 0x1f8   :  { %2447 = vmatpush3.bf16.msra.mxu0 %v2446_v12  ;;  %2269 = vmatprep.mubr.msk.f32.mxu0 %vm2633_vm1, %v2632_v63 }
 0x1f9   :  { %2448 = vmatprep.subr.bf16.mxu0 %v2634_v1 }
 0x1fc   :  { %2450 = vmatpush3.bf16.msra.mxu0 %v2449_v16 }
 0x1fd   :  { %2451 = vmatprep.subr.bf16.mxu0 %v2634_v1 }
 0x2ca   :  { %v823_v20 = vpop.f32.mrb[6].mxu0 }
 0x2cb   :  { %v824_v21 = vadd.f32 %v2064_v17, %v823_v20  ;;  %v2260_v22 = vpop.f32.mrb[7].mxu0 }
 0x2cd   :  { %v827_v24 = vmax.f32 %v824_v21, 0.0 }
 0x2cf   :  { %2270 = vmatmul.mubr.msk.f32.vlgmr.msra.gmra.mrb[8].mxu0 %vm837_vm3, %v827_v24  ;;  %v2084_v24 = vld [vmem:[%s3396_s5 + $0xc0] sm:$0xff] }
 0x2d0   :  { %2453 = vmatpush3.bf16.msra.mxu0 %v2452_v23  ;;  %2280 = vmatprep.mubr.msk.f32.mxu0 %vm2633_vm1, %v2632_v63  ;;  %v2083_v23 = vld [vmem:[%s3396_s5 + $0xb8] sm:$0xff] }
 0x2d1   :  { %2454 = vmatprep.subr.bf16.mxu0 %v2634_v1  ;;  %v2476_v25 = vpack.c.bf16 %v2084_v24, %v2083_v23 }
 0x2d4   :  { %2456 = vmatpush3.bf16.msra.mxu0 %v2455_v27  ;;  %v2085_v27 = vld [vmem:[%s3396_s5 + $0xc8] sm:$0xff] }
 0x2d5   :  { %2463 = vmatprep.subr.bf16.mxu0 %v2634_v1 }
 0x3a2   :  { %v907_v29 = vpop.f32.mrb[8].mxu0 }
 0x3a3   :  { %v908_v30 = vadd.f32 %v2067_v28, %v907_v29  ;;  %v2271_v31 = vpop.f32.mrb[9].mxu0  ;;  %v2086_v28 = vld [vmem:[%s3396_s5 + $0xd0] sm:$0xff] }
 0x3a4   :  { %v2479_v29 = vpack.c.bf16 %v2086_v28, %v2085_v27  ;;  %v2091_v31 = vld [vmem:[%s3396_s5 + $0xe0] sm:$0xff] }
 0x3a5   :  { %v911_v32 = vmax.f32 %v908_v30, 0.0  ;;  %v2090_v30 = vld [vmem:[%s3396_s5 + $0xd8] sm:$0xff] }
 0x3a7   :  { %2281 = vmatmul.mubr.msk.f32.vlgmr.msra.gmra.mrb[10].mxu0 %vm837_vm3, %v911_v32  ;;  %v2482_v32 = vpack.c.bf16 %v2091_v31, %v2090_v30  ;;  %v1794_v30 = vld [vmem:[%s3398_s6] sm:$0xff] }
 0x3a8   :  { %2302 = vmatprep.mubr.msk.f32.mxu0 %vm2633_vm1, %v2632_v63  ;;  %2465 = vmatpush3.bf16.msra.mxu0 %v2464_v44  ;;  %v2088_v44 = vld [vmem:[%s3396_s5 + $0x159] ss:$0 sm:$0xff] }
 0x3a9   :  { %2466 = vmatprep.subr.bf16.mxu0 %v2634_v1 }
 0x3ac   :  { %2468 = vmatpush3.bf16.msra.mxu0 %v2467_v53  ;;  %v2100_v53 = vld [vmem:[%s3396_s5 + $0x110] sm:$0xff] }
 0x3ad   :  { %2316 = vmatprep.subr.mxu0 %v2632_v63  ;;  %v2491_v54 = vpack.c.bf16 %v2100_v53, %v2099_v52  ;;  %v2619_v52 = vld [vmem:[%s3399_s8 + $0x34] ss:$8 sps:$4 sm:$0xff]   ;;  %v2617_v53 = vld [vmem:[%s3399_s8 + $0x30] ss:$8 sps:$4 sm:$0xff]  }
 0x47a   :  { %v990_v46 = vpop.f32.mrb[10].mxu0 }
 0x47b   :  { %v991_v47 = vadd.f32 %v2069_v45, %v990_v46  ;;  %v2282_v48 = vpop.f32.mrb[11].mxu0 }
 0x47d   :  { %v994_v49 = vadd.f32 %v991_v47, %v824_v21 }
 0x47f   :  { %v995_v50 = vmax.f32 %v994_v49, 0.0 }
 0x481   :  { %2292 = vmatmul.mubr.msk.f32.vlgmr.msra.gmra.mrb[6].mxu1 %vm837_vm3, %v995_v50  ;;  %v2098_v50 = vld [vmem:[%s3396_s5 + $0x100] sm:$0xff] }
 0x482   :  { %2313 = vmatprep.mubr.msk.f32.mxu1 %vm2633_vm1, %v2632_v63  ;;  %2471 = vmatpush3.bf16.msra.mxu1 %v2470_v56  ;;  %v2105_v56 = vld [vmem:[%s3396_s5 + $0x120] sm:$0xff] }
 0x483   :  { %2472 = vmatprep.subr.bf16.mxu1 %v2634_v1 }
 0x486   :  { %2474 = vmatpush3.bf16.msra.mxu1 %v2473_v2  ;;  %v2106_v2 = vld [vmem:[%s3396_s5 + $0x128] sm:$0xff] }
 0x487   :  { %2481 = vmatprep.subr.bf16.mxu1 %v2634_v1 }
 0x554   :  { %v1074_v58 = vpop.f32.mrb[6].mxu1 }
 0x555   :  { %v1075_v59 = vadd.f32 %v2071_v57, %v1074_v58  ;;  %v2293_v60 = vpop.f32.mrb[7].mxu1  ;;  %v2494_v57 = vpack.c.bf16 %v2105_v56, %v2104_v55  ;;  %v2095_v58 = vld [vmem:[%s3396_s5 + $0x15a] ss:$0 sm:$0xff] }
 0x557   :  { %v1078_v61 = vmax.f32 %v1075_v59, 0.0 }
 0x559   :  { %2303 = vmatmul.mubr.msk.f32.vlgmr.msra.gmra.mrb[12].mxu0 %vm837_vm3, %v1078_v61 }
 0x55a   :  { %2318 = vmatprep.mubr.msk.f32.mxu0 %vm2633_vm1, %v2632_v63  ;;  %2317 = vmatpush3.msk.msra.mxu0 %vm753_vm0, %v2078_v8  ;;  %v2102_v8 = vld [vmem:[%s3396_s5 + $0x15b] ss:$0 sm:$0xff] }
 0x55b   :  { %2475 = vmatprep.subr.bf16.mxu0 %v2634_v1 }
 0x62c   :  { %v1157_v4 = vpop.f32.mrb[12].mxu0 }
 0x62d   :  { %v1158_v5 = vadd.f32 %v2073_v3, %v1157_v4  ;;  %v2304_v6 = vpop.f32.mrb[13].mxu0  ;;  %v2107_v3 = vld [vmem:[%s3396_s5 + $0x130] sm:$0xff] }
 0x62e   :  { %v2497_v4 = vpack.c.bf16 %v2107_v3, %v2106_v2  ;;  %v2112_v6 = vld [vmem:[%s3396_s5 + $0x140] sm:$0xff] }
 0x62f   :  { %v1161_v7 = vadd.f32 %v1158_v5, %v994_v49  ;;  %v2097_v49 = vld [vmem:[%s3396_s5 + $0xf8] sm:$0xff] }
 0x630   :  { %v2488_v51 = vpack.c.bf16 %v2098_v50, %v2097_v49  ;;  %v2111_v5 = vld [vmem:[%s3396_s5 + $0x138] sm:$0xff]  ;;  %v2616_v50 = vld [vmem:[%s3399_s8 + $0x24] ss:$8 sps:$4 sm:$0xff]  }
 0x631   :  { %2314 = vmatmul.mubr.msk.f32.vlgmr.msra.gmra.mrb[8].mxu1 %vm837_vm3, %v1161_v7  ;;  %v2500_v7 = vpack.c.bf16 %v2112_v6, %v2111_v5  ;;  %v2611_v49 = vld [vmem:[%s3399_s8 + $0x10] ss:$8 sps:$4 sm:$0xff]  }
 0x632   :  { %2340 = vmatprep.mubr.msk.f32.mxu1 %vm2633_vm1, %v2632_v63  ;;  %2483 = vmatpush3.bf16.msra.mxu1 %v2482_v32 }
 0x633   :  { %2484 = vmatprep.subr.bf16.mxu1 %v2634_v1 }
 0x636   :  { %2486 = vmatpush3.bf16.msra.mxu1 %v2485_v43 }
 0x637   :  { %2493 = vmatprep.subr.bf16.mxu1 %v2634_v1 }
 0x704   :  { %v1240_v10 = vpop.f32.mrb[8].mxu1 }
 0x705   :  { %v1241_v11 = vadd.f32 %v2075_v9, %v1240_v10  ;;  %v2315_v12 = vpop.f32.mrb[9].mxu1 }
 0x707   :  { %1254 = vrot.lane.b32.xlu0 %v1241_v11, %s2635_s4  ;;  %v1244_v14 = vadd.f32 2.0, %v1241_v11 }
 0x709   :  { %v2077_v15 = vmul.f32 -1.442695, %v1244_v14  ;;  %v2113_v14 = vld [vmem:[%s3396_s5 + $0x148] sm:$0xff] }
 0x70b   :  { %2620 = vpow2.f32 %v2077_v15 }
 0x715   :  { %v2621_v16 = vpop.eup %2620 }
 0x716   :  { %v1248_v17 = vadd.f32 1.0, %v2621_v16  ;;  %v2109_v16 = vld [vmem:[%s3396_s5 + $0x15c] ss:$0 sm:$0xff] }
 0x718   :  { %2622 = vrcp.f32 %v1248_v17 }
 0x722   :  { %v2623_v18 = vpop.eup %2622 }
 0x723   :  { %v3225_v19 = vadd.f32 0.001, %v2623_v18 }
 0x725   :  { %v1252_v20 = vmul.f32 %v3225_v19, %v3117_v13 }
 0x779   :  { %v1255_v21 = vpop.permute.xlu0 %1254 }
 0x77a   :  { %v3229_v22 = vadd.f32 %v1255_v21, %v1252_v20 }
 0x77c   :  { %1276 = vrot.lane.b32.xlu0 %v3229_v22, %s2636_s29 }
 0x7ee   :  { %v1277_v26 = vpop.permute.xlu0 %1276 }
 0x7ef   :  { %2319 = vmatmul.mubr.msk.f32.vlgmr.msra.gmra.mrb[14].mxu0 %vm749_vm2, %v1277_v26 }
 0x7f0   :  { %2477 = vmatpush3.bf16.msra.mxu0 %v2476_v25  ;;  %2329 = vmatprep.mubr.msk.f32.mxu0 %vm2633_vm1, %v2632_v63 }
 0x7f1   :  { %2478 = vmatprep.subr.bf16.mxu0 %v2634_v1 }
 0x7f4   :  { %2480 = vmatpush3.bf16.msra.mxu0 %v2479_v29 }
 0x7f5   :  { %2487 = vmatprep.subr.bf16.mxu0 %v2634_v1 }
 0x8c2   :  { %v1349_v34 = vpop.f32.mrb[14].mxu0 }
 0x8c3   :  { %v1350_v35 = vadd.f32 %v2080_v33, %v1349_v34  ;;  %v2320_v36 = vpop.f32.mrb[15].mxu0 }
 0x8c5   :  { %v1353_v39 = vmax.f32 %v1350_v35, 0.0 }
 0x8c7   :  { %2330 = vmatmul.mubr.msk.f32.vlgmr.msra.gmra.mrb[16].mxu0 %vm837_vm3, %v1353_v39 }
 0x8c8   :  { %2351 = vmatprep.mubr.msk.f32.mxu0 %vm2633_vm1, %v2632_v63  ;;  %2489 = vmatpush3.bf16.msra.mxu0 %v2488_v51  ;;  %v2614_v51 = vld [vmem:[%s3399_s8 + $0x20] ss:$8 sps:$4 sm:$0xff]  }
 0x8c9   :  { %2490 = vmatprep.subr.bf16.mxu0 %v2634_v1 }
 0x8cc   :  { %2492 = vmatpush3.bf16.msra.mxu0 %v2491_v54  ;;  %v2638_v54 = vmov 0  }
 0x8cd   :  { %2499 = vmatprep.subr.bf16.mxu0 %v2634_v1 }
 0x99a   :  { %v1432_v45 = vpop.f32.mrb[16].mxu0 }
 0x99b   :  { %v1433_v46 = vadd.f32 %v2088_v44, %v1432_v45  ;;  %v2331_v47 = vpop.f32.mrb[17].mxu0 }
 0x99c   :  { %v2608_v47 = vld [vmem:[%s3399_s8] ss:$8 sps:$4 sm:$0xff]  }
 0x99d   :  { %v1436_v48 = vmax.f32 %v1433_v46, 0.0 }
 0x99f   :  { %2341 = vmatmul.mubr.msk.f32.vlgmr.msra.gmra.mrb[10].mxu1 %vm837_vm3, %v1436_v48  ;;  %v2610_v48 = vld [vmem:[%s3399_s8 + $0x4] ss:$8 sps:$4 sm:$0xff]  }
 0x9a0   :  { %2362 = vmatprep.mubr.msk.f32.mxu1 %vm2633_vm1, %v2632_v63  ;;  %2495 = vmatpush3.bf16.msra.mxu1 %v2494_v57 }
 0x9a1   :  { %2496 = vmatprep.subr.bf16.mxu1 %v2634_v1 }
 0x9a4   :  { %2498 = vmatpush3.bf16.msra.mxu1 %v2497_v4 }
 0x9a5   :  { %2376 = vmatprep.subr.mxu1 %v2632_v63 }
 0xa72   :  { %v1515_v59 = vpop.f32.mrb[10].mxu1 }
 0xa73   :  { %v1516_v60 = vadd.f32 %v2095_v58, %v1515_v59  ;;  %v2342_v61 = vpop.f32.mrb[11].mxu1 }
 0xa75   :  { %v1519_v62 = vadd.f32 %v1516_v60, %v1350_v35 }
 0xa77   :  { %v1520_v0 = vmax.f32 %v1519_v62, 0.0 }
 0xa79   :  { %2352 = vmatmul.mubr.msk.f32.vlgmr.msra.gmra.mrb[18].mxu0 %vm837_vm3, %v1520_v0 }
 0xa7a   :  { %2373 = vmatprep.mubr.msk.f32.mxu0 %vm2633_vm1, %v2632_v63  ;;  %2501 = vmatpush3.bf16.msra.mxu0 %v2500_v7 }
 0xa7b   :  { %2502 = vmatprep.subr.bf16.mxu0 %v2634_v1  ;;  %v2114_v1 = vld [vmem:[%s3396_s5 + $0x150] sm:$0xff] }
 0xa7c   :  { %v2503_v15 = vpack.c.bf16 %v2114_v1, %v2113_v14 }
 0xa7e   :  { %2504 = vmatpush3.bf16.msra.mxu0 %v2503_v15 }
 0xb4c   :  { %v1599_v9 = vpop.f32.mrb[18].mxu0 }
 0xb4d   :  { %v1600_v10 = vadd.f32 %v2102_v8, %v1599_v9  ;;  %v2353_v11 = vpop.f32.mrb[19].mxu0 }
 0xb4f   :  { %v1603_v12 = vmax.f32 %v1600_v10, 0.0 }
 0xb51   :  { %2363 = vmatmul.mubr.msk.f32.vlgmr.msra.gmra.mrb[12].mxu1 %vm837_vm3, %v1603_v12 }
 0xb52   :  { %2378 = vmatprep.mubr.msk.f32.mxu1 %vm2633_vm1, %v2632_v63  ;;  %v2116_v63 = vld [vmem:[%s3396_s5 + $0x15d] ss:$0 sm:$0xff]  ;;  %2377 = vmatpush3.msra.mxu1 %v1794_v30 }
 0xb53   :  { %1942 = vmatprep.subr.bf16.mxu1 %v2610_v48 }
 0xc24   :  { %v1682_v17 = vpop.f32.mrb[12].mxu1 }
 0xc25   :  { %v1683_v18 = vadd.f32 %v2109_v16, %v1682_v17  ;;  %v2364_v20 = vpop.f32.mrb[13].mxu1 }
 0xc27   :  { %v1686_v21 = vadd.f32 %v1683_v18, %v1519_v62  ;;  %v2119_v62 = vld [vmem:[%s3401_s7] ss:$0 sm:$0xff] }
 0xc29   :  { %2374 = vmatmul.mubr.msk.f32.vlgmr.msra.gmra.mrb[20].mxu0 %vm837_vm3, %v1686_v21 }
 0xcfc   :  { %v1765_v23 = vpop.f32.mrb[20].mxu0 }
 0xcfd   :  { %v1766_v24 = vadd.f32 %v2116_v63, %v1765_v23  ;;  %v2375_v25 = vpop.f32.mrb[21].mxu0 }
 0xcff   :  { %v1769_v26 = vadd.f32 2.0, %v1766_v24 }
 0xd01   :  { %v2118_v27 = vmul.f32 -1.442695, %v1769_v26 }
 0xd03   :  { %2624 = vpow2.f32 %v2118_v27 }
 0xd0d   :  { %v2625_v28 = vpop.eup %2624 }
 0xd0e   :  { %v1773_v29 = vadd.f32 1.0, %v2625_v28 }
 0xd10   :  { %2626 = vrcp.f32 %v1773_v29 }
 0xd11   :  { %2628 = vlog2.f32 %v3225_v19 }
 0xd1a   :  { %v2627_v31 = vpop.eup %2626 }
 0xd1b   :  { %v1776_v32 = vadd.f32 0.001, %v2627_v31  ;;  %v2629_v33 = vpop.eup %2628 }
 0xd1c   :  { %v1259_v34 = vmul.f32 0.6931472, %v2629_v33 }
 0xd1d   :  { %1778 = vrot.lane.b32.xlu1 %v1776_v32, %s2636_s29  ;;  %2630 = vlog2.f32 %v1776_v32 }
 0xd21   :  { %1261 = vrot.lane.b32.xlu1 %v1259_v34, %s2636_s29 }
 0xd27   :  { %v2631_v35 = vpop.eup %2630 }
 0xd28   :  { %v1784_v36 = vmul.f32 0.6931472, %v2631_v35 }
 0xd2a   :  { %1786 = vrot.lane.b32.xlu0 %v1784_v36, %s2636_s29  ;;  %s2637_s29 = smov 16  }
 0xd8f   :  { %v1779_v39 = vpop.permute.xlu1 %1778 }
 0xd90   :  { %v1781_v19 = vmul.f32 %v1779_v39, %v3117_v13 }
 0xd92   :  { %v1782_v40 = vadd.f32 %v1781_v19, %v1766_v24 }
 0xd93   :  { %v1262_v42 = vpop.permute.xlu1 %1261 }
 0xd94   :  { %v1793_v43 = vsel %vm749_vm2, %v1782_v40, %v3229_v22  ;;  %v1264_v44 = vsel %vm749_vm2, %v1262_v42, 0.0  ;;  %v2613_v22 = vld [vmem:[%s3399_s8 + $0x14] ss:$8 sps:$4 sm:$0xff]  }
 0xd95   :  { %2379 = vmatmul.mubr.msk.f32.vlgmr.msra.gmra.mrb[14].mxu1 %vm1802_vm4, %v1793_v43  ;;  %1265 = vadd.xlane.f32.xlu1 %v1264_v44 }
 0xd96   :  { %1943 = vmatpush1.bf16.msra.mxu1 %v2608_v47  ;;  %1974 = vmatprep.mubr.bf16.mxu1 %v2638_v54 }
 0xd97   :  { %1944 = vmatprep.subr.bf16.mxu1 %v2613_v22 }
 0xd9a   :  { %1945 = vmatpush1.bf16.msra.mxu1 %v2611_v49 }
 0xd9b   :  { %1946 = vmatprep.subr.bf16.mxu1 %v2616_v50 }
 0xd9c   :  { %v1787_v45 = vpop.permute.xlu0 %1786 }
 0xd9d   :  { %v1789_v46 = vsel %vm749_vm2, %v1787_v45, 0.0 }
 0xd9e   :  { %1790 = vadd.xlane.f32.xlu0 %v1789_v46  ;;  %1947 = vmatpush1.bf16.msra.mxu1 %v2614_v51 }
 0xd9f   :  { %1948 = vmatprep.subr.bf16.mxu1 %v2619_v52 }
 0xda2   :  { %1949 = vmatpush1.bf16.msra.mxu1 %v2617_v53 }
 0xdb4   :  { %1983 = vrot.lane.b32.xlu0 %v1793_v43, %s2637_s29 }
 0xe22   :  { %v1266_v56 = vpop.xlane.xlu1 %1265 }
 0xe2b   :  { %v1791_v55 = vpop.xlane.xlu0 %1790 }
 0xe2c   :  { %v1792_v57 = vadd.f32 %v1791_v55, %v1266_v56 }
 0xe2f   :  { %v1984_v58 = vpop.permute.xlu0 %1983 }
 0xe30   :  { %v1987_v59 = vsel %vm1986_vm5, %v3117_v13, %v1984_v58  ;;  %v1886_v13 = vld [vmem:[%s3402_s9] sm:$0x3] }
 0xe31   :  { %v1989_v60 = vsel %vm1988_vm6, %v1987_v59, %v1792_v57  ;;  %v1891_v6 = vrot.slane %v1886_v13, %v108_v38  ;;  %v1895_v7 = vrot.slane %v1886_v13, %v112_v41 }
 0xe32   :  { %v1991_v61 = vsel %vm1990_vm7, %v1989_v60, 0.0 }
 0xe33   :  { %1994 = vst [vmem:[%s3400_s10 + $0x10] sm:$0xff] %v1991_v61 }
 0xe68   :  { %v1872_v0 = vpop.f32.mrb[14].mxu1 }
 0xe69   :  { %v1873_v2 = vadd.f32 %v2119_v62, %v1872_v0  ;;  %v2380_v3 = vpop.f32.mrb[15].mxu1 }
 0xe6b   :  { %v1876_v4 = vmax.f32 %v1873_v2, 0.0 }
 0xe6d   :  { %v1877_v5 = vpack.c.bf16 %v1876_v4, %v1876_v4 }
 0xe6f   :  { %2129 = vmatmul.mubr.msk.bf16.vlgmr.msra.gmra.mrb[16].mxu1 %vm1938_vm8, %v1877_v5 }
 0xf42   :  { %v1976_v8 = vpop.f32.mrb[16].mxu1 }
 0xf43   :  { %v1977_v9 = vadd.f32 %v1976_v8, %v1891_v6  ;;  %v1978_v10 = vpop.f32.mrb[17].mxu1 }
 0xf44   :  { %v1979_v11 = vadd.f32 %v1978_v10, %v1895_v7  ;;  %v1980_v12 = vpop.f32.mrb[18].mxu1 }
 0xf45   :  { %1992 = vst [vmem:[%s3400_s10] sm:$0xff] %v1977_v9  ;;  %v1981_v14 = vpop.f32.mrb[19].mxu1 }
 0xf46   :  { %1993 = vst [vmem:[%s3400_s10 + $0x8] sm:$0xff] %v1979_v11 }

</bundles_post_ra>
